<compile_context>
chip_gen: v7x
topology: tpu7x:2x2x1
jax: 0.10.0
libtpu: 0.0.40
codegen_flags: <defaults>
</compile_context>

<pallas_src>
import functools

import jax
import jax.numpy as jnp
from jax import lax
from jax.experimental import pallas as pl
from jax.experimental.pallas import tpu as pltpu

LANE = 128
SUBLANE_BF16 = 16   # bf16 native sublane tile; batch rows are padded to this


def _round_up(x, m):
    return (x + m - 1) // m * m


# -----------------------------------------------------------------------------
# Pallas kernel: time-chunked LSTM recurrence + MLP head + log_softmax
# -----------------------------------------------------------------------------
def _lstm_head_kernel(hidden, seq_len, ts,
                      xproj_ref,   # (Ts, Bt, GP) bf16  pre-projected gates (+bias)
                      whh_ref,     # (HK, GP)     bf16  recurrent weight (zero-padded)
                      w1_ref,      # (HK, 128)    f32
                      b1_ref,      # (1, 128)     f32
                      w2_ref,      # (128, RP)    f32
                      b2_ref,      # (1, RP)      f32   (pad lanes = -1e30)
                      out_ref,     # (Bt, RP)     f32
                      h_scr,       # (Bt, GP)     f32   carried across time chunks
                      c_scr):      # (Bt, GP)     f32
    hk, gp = whh_ref.shape
    bt = h_scr.shape[0]

    @pl.when(pl.program_id(1) == 0)
    def _init():
        h_scr[...] = jnp.zeros_like(h_scr)
        c_scr[...] = jnp.zeros_like(c_scr)

    # Resident bf16 MXU operand: only 8 vregs for H<=32 after gate packing,
    # so hoisting it out of the unrolled loop is spill-safe.
    whh = whh_ref[...]

    # Precomputed lane mask selecting the g-gate lanes (tanh) vs i/f/o (sigmoid).
    lane = lax.broadcasted_iota(jnp.int32, (bt, gp), 1)
    is_g = jnp.logical_and(lane >= 2 * hidden, lane < 3 * hidden)

    t0 = pl.program_id(1) * ts
    needs_mask = (seq_len % ts) != 0   # static python bool

    def step(t, carry):
        h, c = carry
        # Only in-loop matmul: (Bt, HK) @ (HK, GP), bf16 operands, f32 accum.
        gates = (xproj_ref[t].astype(jnp.float32)
                 + jnp.dot(h[:, :hk].astype(whh.dtype), whh,
                           preferred_element_type=jnp.float32))
        # Packed activation: tanh on g lanes, sigmoid elsewhere (2 EUP passes).
        act = jnp.where(is_g, jnp.tanh(gates), jax.nn.sigmoid(gates))
        # Align f/g/o with c/h (which live in lanes [0, H)) via XLU rolls.
        f_al = pltpu.roll(act, shift=gp - hidden, axis=1)
        g_al = pltpu.roll(act, shift=gp - 2 * hidden, axis=1)
        o_al = pltpu.roll(act, shift=gp - 3 * hidden, axis=1)
        # Lanes [0, H) are the real state; higher lanes carry bounded junk that
        # is killed by the zero-padded rows of whh / w1 before every matmul.
        c_new = f_al * c + act * g_al          # act lanes [0,H) == i gate
        h_new = o_al * jnp.tanh(c_new)
        if needs_mask:                          # tail steps past seq_len: no-op
            valid = (t0 + t) < seq_len
            h_new = jnp.where(valid, h_new, h)
            c_new = jnp.where(valid, c_new, c)
        return h_new, c_new

    h, c = lax.fori_loop(0, ts, step, (h_scr[...], c_scr[...]),
                         unroll=min(8, ts))
    h_scr[...] = h
    c_scr[...] = c

    @pl.when(pl.program_id(1) == pl.num_programs(1) - 1)
    def _head():
        hid = jnp.dot(h[:, :hk], w1_ref[...],
                      preferred_element_type=jnp.float32) + b1_ref[...]
        hid = jnp.maximum(hid, 0.0)
        logits = jnp.dot(hid, w2_ref[...],
                         preferred_element_type=jnp.float32) + b2_ref[...]
        m = jnp.max(logits, axis=-1, keepdims=True)
        shifted = logits - m
        lse = jnp.log(jnp.sum(jnp.exp(shifted), axis=-1, keepdims=True))
        out_ref[...] = shifted - lse


# -----------------------------------------------------------------------------
# Wrapper: gather + project embeddings once, pad to hardware tiles, launch the
# (batch-tile, time-chunk) grid, un-pad the result.
# -----------------------------------------------------------------------------
@functools.partial(jax.jit, static_argnames=("time_chunk",))
def who_rapped_it_forward(tokens, params, *, time_chunk=128):
    """tokens: (seq_len, batch) int32.  Returns (batch, n_rappers) f32 log-probs."""
    seq_len, batch = tokens.shape
    emb = params["embedding"]                                 # (V, E)
    w_ih, w_hh, b = params["w_ih"], params["w_hh"], params["b_lstm"]
    w1, b1, w2, b2 = params["w1"], params["b1"], params["w2"], params["b2"]
    hidden = w_hh.shape[0]
    n_rappers = w2.shape[1]

    gp = _round_up(4 * hidden, LANE)          # packed gate width (128 for H=32)
    hk = _round_up(hidden, LANE)              # recurrent matmul K
    rp = _round_up(n_rappers, LANE)

    bp0 = _round_up(max(batch, 1), SUBLANE_BF16)
    bt = min(bp0, 256)                        # keep whole batch in one MXU tile
    bp = _round_up(bp0, bt)
    nb = bp // bt

    ts = min(time_chunk, seq_len)
    nt = pl.cdiv(seq_len, ts)
    sp = nt * ts                              # time padded (tail masked in-kernel)

    # Gather embedding rows first (no V-sized projection table), fold the input
    # projection + both LSTM biases in, keep packed (i|f|g|o) gate order, bf16.
    embeds = jnp.take(emb, tokens, axis=0)                                 # (S,B,E)
    xproj = jnp.dot(embeds, w_ih, preferred_element_type=jnp.float32) + b  # (S,B,4H)
    xproj_p = jnp.zeros((sp, bp, gp), jnp.bfloat16)
    xproj_p = xproj_p.at[:seq_len, :batch, :4 * hidden].set(
        xproj.astype(jnp.bfloat16))

    whh_p = (jnp.zeros((hk, gp), jnp.float32)
             .at[:hidden, :4 * hidden].set(w_hh)
             .astype(jnp.bfloat16))                 # bf16 MXU operand, f32 accum
    w1_p = jnp.zeros((hk, 128), jnp.float32).at[:hidden].set(w1)
    w2_p = jnp.zeros((128, rp), jnp.float32).at[:, :n_rappers].set(w2)
    # Padded logit lanes get -1e30 so exp() underflows to 0 in the softmax sum.
    b2_p = jnp.full((1, rp), -1e30, jnp.float32).at[:, :n_rappers].set(b2)

    kernel = functools.partial(_lstm_head_kernel, hidden, seq_len, ts)

    out = pl.pallas_call(
        kernel,
        out_shape=jax.ShapeDtypeStruct((bp, rp), jnp.float32),
        grid_spec=pltpu.PrefetchScalarGridSpec(
            num_scalar_prefetch=0,
            grid=(nb, nt),                        # (batch tiles, time chunks)
            in_specs=[
                pl.BlockSpec((ts, bt, gp), lambda bb, tt: (tt, bb, 0)),  # streamed
                pl.BlockSpec((hk, gp), lambda bb, tt: (0, 0)),           # resident
                pl.BlockSpec((hk, 128), lambda bb, tt: (0, 0)),
                pl.BlockSpec((1, 128), lambda bb, tt: (0, 0)),
                pl.BlockSpec((128, rp), lambda bb, tt: (0, 0)),
                pl.BlockSpec((1, rp), lambda bb, tt: (0, 0)),
            ],
            out_specs=pl.BlockSpec((bt, rp), lambda bb, tt: (bb, 0)),
            scratch_shapes=[pltpu.VMEM((bt, gp), jnp.float32),   # h carry
                            pltpu.VMEM((bt, gp), jnp.float32)],  # c carry
        ),
        compiler_params=pltpu.CompilerParams(
            # Batch tiles are independent (sharded across v7x's two TCs when
            # nb > 1); the time axis is the serial recurrence.
            dimension_semantics=("parallel", "arbitrary"),
            vmem_limit_bytes=32 * 1024 * 1024,   # v7x-safe (64 MiB physical VMEM)
        ),
    )(xproj_p, whh_p, w1_p, b1, w2_p, b2_p)

    return out[:batch, :n_rappers]


# -----------------------------------------------------------------------------
# Deterministic parameter init (shapes follow the PyTorch module)
# -----------------------------------------------------------------------------
def init_params(key, vocab_size, embedding_dim, hidden_dim, n_rappers):
    ks = jax.random.split(key, 9)
    scale_lstm = 1.0 / jnp.sqrt(hidden_dim)

    def u(k, shape, s):
        return jax.random.uniform(k, shape, jnp.float32, minval=-s, maxval=s)

    return {
        "embedding": jax.random.normal(ks[0], (vocab_size, embedding_dim), jnp.float32),
        # stored pre-transposed: (in, 4H) / (H, 4H); gate order i, f, g, o
        "w_ih": u(ks[1], (embedding_dim, 4 * hidden_dim), scale_lstm),
        "w_hh": u(ks[2], (hidden_dim, 4 * hidden_dim), scale_lstm),
        # combined b_ih + b_hh, kept 2D for TPU layout friendliness
        "b_lstm": u(ks[3], (1, 4 * hidden_dim), scale_lstm)
                  + u(ks[4], (1, 4 * hidden_dim), scale_lstm),
        "w1": u(ks[5], (hidden_dim, 128), 1.0 / jnp.sqrt(hidden_dim)),
        "b1": u(ks[6], (1, 128), 1.0 / jnp.sqrt(hidden_dim)),
        "w2": u(ks[7], (128, n_rappers), 1.0 / jnp.sqrt(128.0)),
        "b2": u(ks[8], (1, n_rappers), 1.0 / jnp.sqrt(128.0)),
    }


# -----------------------------------------------------------------------------
# Pure-JAX reference mirroring the kernel's numerics (bf16 xproj stream, bf16
# recurrent-weight matmul, f32 elementwise) for the sanity check.
# -----------------------------------------------------------------------------
def reference_forward(tokens, params):
    embeds = jnp.take(params["embedding"], tokens, axis=0)        # (S, B, E)
    H = params["w_hh"].shape[0]
    B = tokens.shape[1]
    w_hh_bf16 = params["w_hh"].astype(jnp.bfloat16)

    xproj = (jnp.dot(embeds, params["w_ih"], preferred_element_type=jnp.float32)
             + params["b_lstm"])
    xproj = xproj.astype(jnp.bfloat16).astype(jnp.float32)        # (S, B, 4H)

    def step(carry, x):
        h, c = carry
        gates = x + jnp.dot(h.astype(jnp.bfloat16), w_hh_bf16,
                            preferred_element_type=jnp.float32)
        i = jax.nn.sigmoid(gates[:, 0 * H:1 * H])
        f = jax.nn.sigmoid(gates[:, 1 * H:2 * H])
        g = jnp.tanh(gates[:, 2 * H:3 * H])
        o = jax.nn.sigmoid(gates[:, 3 * H:4 * H])
        c = f * c + i * g
        h = o * jnp.tanh(c)
        return (h, c), None

    init = (jnp.zeros((B, H), jnp.float32), jnp.zeros((B, H), jnp.float32))
    (h, _), _ = lax.scan(step, init, xproj)
    hid = jnp.maximum(jnp.dot(h, params["w1"]) + params["b1"], 0.0)
    logits = jnp.dot(hid, params["w2"]) + params["b2"]
    return jax.nn.log_softmax(logits, axis=1)


if __name__ == "__main__":
    vocab_size = 50
    embedding_dim = 16
    hidden_dim = 32
    batch_size = 2
    n_rappers = 8
    seq_len = 8

    key = jax.random.PRNGKey(0)
    pkey, tkey = jax.random.split(key)
    params = init_params(pkey, vocab_size, embedding_dim, hidden_dim, n_rappers)
    tokens = jax.random.randint(tkey, (seq_len, batch_size), 0, vocab_size, jnp.int32)

    log_probs = who_rapped_it_forward(tokens, params)
    log_probs = jax.block_until_ready(log_probs)

    ref = reference_forward(tokens, params)
    assert log_probs.shape == (batch_size, n_rappers)
    # tolerance covers the (matched) bf16 xproj stream + bf16 recurrent weights
    assert jnp.allclose(log_probs, ref, atol=2e-3, rtol=2e-3), "mismatch vs reference"

    print("KERNEL_OK")
</pallas_src>

<mosaic_0001>
module attributes {stable_mosaic.version = 11 : i64} {
  func.func @_lstm_head_kernel(%arg0: i32, %arg1: i32, %arg2: memref<8x16x128xbf16, #tpu.memory_space<vmem>>, %arg3: memref<128x128xbf16, #tpu.memory_space<vmem>>, %arg4: memref<128x128xf32, #tpu.memory_space<vmem>>, %arg5: memref<1x128xf32, #tpu.memory_space<vmem>>, %arg6: memref<128x128xf32, #tpu.memory_space<vmem>>, %arg7: memref<1x128xf32, #tpu.memory_space<vmem>>, %arg8: memref<16x128xf32, #tpu.memory_space<vmem>>, %arg9: memref<16x128xf32, #tpu.memory_space<vmem>>, %arg10: memref<16x128xf32, #tpu.memory_space<vmem>>) attributes {dimension_semantics = [#tpu.dimension_semantics<parallel>, #tpu.dimension_semantics<arbitrary>], iteration_bounds = array<i64: 1, 1>, scalar_prefetch = 0 : i64, scratch_operands = 2 : i64, tpu.core_type = #tpu.core_type<tc>, window_params = [{transform_indices = @transform_0, window_bounds = array<i64: 8, 16, 128>}, {pipeline_mode = #tpu.pipeline_mode<synchronous>, transform_indices = @transform_1, window_bounds = array<i64: 128, 128>}, {pipeline_mode = #tpu.pipeline_mode<synchronous>, transform_indices = @transform_2, window_bounds = array<i64: 128, 128>}, {pipeline_mode = #tpu.pipeline_mode<synchronous>, transform_indices = @transform_3, window_bounds = array<i64: 1, 128>}, {pipeline_mode = #tpu.pipeline_mode<synchronous>, transform_indices = @transform_4, window_bounds = array<i64: 128, 128>}, {pipeline_mode = #tpu.pipeline_mode<synchronous>, transform_indices = @transform_5, window_bounds = array<i64: 1, 128>}, {transform_indices = @transform_6, window_bounds = array<i64: 16, 128>}]} {
    %c0_i32 = arith.constant 0 : i32
    %0 = arith.cmpi eq, %arg1, %c0_i32 : i32
    %1 = arith.extui %0 : i1 to i32
    %c0_i32_0 = arith.constant 0 : i32
    %2 = arith.cmpi ne, %1, %c0_i32_0 : i32
    scf.if %2 {
      %cst_67 = arith.constant 0.000000e+00 : f32
      %193 = vector.broadcast %cst_67 : f32 to vector<16x128xf32>
      %c0_68 = arith.constant 0 : index
      %c0_69 = arith.constant 0 : index
      %194 = vector.load %arg9[%c0_68, %c0_69] : memref<16x128xf32, #tpu.memory_space<vmem>>, vector<16x128xf32>
      tpu.vector_store %arg9[%c0_68, %c0_69], %193 {strides = array<i32>} : memref<16x128xf32, #tpu.memory_space<vmem>>, vector<16x128xf32>,
      %cst_70 = arith.constant 0.000000e+00 : f32
      %195 = vector.broadcast %cst_70 : f32 to vector<16x128xf32>
      %c0_71 = arith.constant 0 : index
      %c0_72 = arith.constant 0 : index
      %196 = vector.load %arg10[%c0_71, %c0_72] : memref<16x128xf32, #tpu.memory_space<vmem>>, vector<16x128xf32>
      tpu.vector_store %arg10[%c0_71, %c0_72], %195 {strides = array<i32>} : memref<16x128xf32, #tpu.memory_space<vmem>>, vector<16x128xf32>,
    } else {
    }
    %c0 = arith.constant 0 : index
    %c0_1 = arith.constant 0 : index
    %3 = vector.load %arg3[%c0, %c0_1] : memref<128x128xbf16, #tpu.memory_space<vmem>>, vector<128x128xbf16>
    %4 = tpu.iota {dimensions = array<i32: 1>} : vector<16x128xi32>
    %c64_i32 = arith.constant 64 : i32
    %5 = vector.broadcast %c64_i32 : i32 to vector<16x128xi32>
    %6 = arith.cmpi sge, %4, %5 : vector<16x128xi32>
    %c96_i32 = arith.constant 96 : i32
    %7 = vector.broadcast %c96_i32 : i32 to vector<16x128xi32>
    %8 = arith.cmpi slt, %4, %7 : vector<16x128xi32>
    %9 = arith.andi %6, %8 : vector<16x128xi1>
    %c0_2 = arith.constant 0 : index
    %c0_3 = arith.constant 0 : index
    %10 = vector.load %arg9[%c0_2, %c0_3] : memref<16x128xf32, #tpu.memory_space<vmem>>, vector<16x128xf32>
    %c0_4 = arith.constant 0 : index
    %c0_5 = arith.constant 0 : index
    %11 = vector.load %arg10[%c0_4, %c0_5] : memref<16x128xf32, #tpu.memory_space<vmem>>, vector<16x128xf32>
    %c0_i32_6 = arith.constant 0 : i32
    %12 = arith.index_cast %c0_i32_6 : i32 to index
    %c0_7 = arith.constant 0 : index
    %c0_8 = arith.constant 0 : index
    %13 = vector.load %arg2[%12, %c0_7, %c0_8] : memref<8x16x128xbf16, #tpu.memory_space<vmem>>, vector<1x16x128xbf16>
    %14 = vector.shape_cast %13 : vector<1x16x128xbf16> to vector<16x128xbf16>
    %15 = arith.extf %14 : vector<16x128xbf16> to vector<16x128xf32>
    %16 = arith.truncf %10 : vector<16x128xf32> to vector<16x128xbf16>
    %cst = arith.constant dense<0.000000e+00> : vector<16x128xf32>
    %17 = tpu.matmul %16, %3, %cst {dimension_numbers = #tpu.dot_dimension_numbers<[1], [0], [0], [1], [0, 0, 1, 1], [], []>} : vector<16x128xbf16>, vector<128x128xbf16>, vector<16x128xf32> -> vector<16x128xf32>
    %18 = arith.addf %15, %17 : vector<16x128xf32>
    %19 = math.tanh %18 : vector<16x128xf32>
    %20 = arith.negf %18 : vector<16x128xf32>
    %21 = math.exp %20 : vector<16x128xf32>
    %cst_9 = arith.constant 1.000000e+00 : f32
    %22 = vector.broadcast %cst_9 : f32 to vector<16x128xf32>
    %23 = arith.addf %22, %21 : vector<16x128xf32>
    %24 = arith.divf %22, %23 : vector<16x128xf32>
    %25 = arith.select %9, %19, %24 : vector<16x128xi1>, vector<16x128xf32>
    %c96_i32_10 = arith.constant 96 : i32
    %26 = tpu.dynamic_rotate %25 by %c96_i32_10 dim 1 : vector<16x128xf32>, i32 -> vector<16x128xf32>
    %c64_i32_11 = arith.constant 64 : i32
    %27 = tpu.dynamic_rotate %25 by %c64_i32_11 dim 1 : vector<16x128xf32>, i32 -> vector<16x128xf32>
    %c32_i32 = arith.constant 32 : i32
    %28 = tpu.dynamic_rotate %25 by %c32_i32 dim 1 : vector<16x128xf32>, i32 -> vector<16x128xf32>
    %29 = arith.mulf %26, %11 : vector<16x128xf32>
    %30 = arith.mulf %25, %27 : vector<16x128xf32>
    %31 = arith.addf %29, %30 : vector<16x128xf32>
    %32 = math.tanh %31 : vector<16x128xf32>
    %33 = arith.mulf %28, %32 : vector<16x128xf32>
    %c1_i32 = arith.constant 1 : i32
    %34 = arith.index_cast %c1_i32 : i32 to index
    %c0_12 = arith.constant 0 : index
    %c0_13 = arith.constant 0 : index
    %35 = vector.load %arg2[%34, %c0_12, %c0_13] : memref<8x16x128xbf16, #tpu.memory_space<vmem>>, vector<1x16x128xbf16>
    %36 = vector.shape_cast %35 : vector<1x16x128xbf16> to vector<16x128xbf16>
    %37 = arith.extf %36 : vector<16x128xbf16> to vector<16x128xf32>
    %38 = arith.truncf %33 : vector<16x128xf32> to vector<16x128xbf16>
    %cst_14 = arith.constant dense<0.000000e+00> : vector<16x128xf32>
    %39 = tpu.matmul %38, %3, %cst_14 {dimension_numbers = #tpu.dot_dimension_numbers<[1], [0], [0], [1], [0, 0, 1, 1], [], []>} : vector<16x128xbf16>, vector<128x128xbf16>, vector<16x128xf32> -> vector<16x128xf32>
    %40 = arith.addf %37, %39 : vector<16x128xf32>
    %41 = math.tanh %40 : vector<16x128xf32>
    %42 = arith.negf %40 : vector<16x128xf32>
    %43 = math.exp %42 : vector<16x128xf32>
    %cst_15 = arith.constant 1.000000e+00 : f32
    %44 = vector.broadcast %cst_15 : f32 to vector<16x128xf32>
    %45 = arith.addf %44, %43 : vector<16x128xf32>
    %46 = arith.divf %44, %45 : vector<16x128xf32>
    %47 = arith.select %9, %41, %46 : vector<16x128xi1>, vector<16x128xf32>
    %c96_i32_16 = arith.constant 96 : i32
    %48 = tpu.dynamic_rotate %47 by %c96_i32_16 dim 1 : vector<16x128xf32>, i32 -> vector<16x128xf32>
    %c64_i32_17 = arith.constant 64 : i32
    %49 = tpu.dynamic_rotate %47 by %c64_i32_17 dim 1 : vector<16x128xf32>, i32 -> vector<16x128xf32>
    %c32_i32_18 = arith.constant 32 : i32
    %50 = tpu.dynamic_rotate %47 by %c32_i32_18 dim 1 : vector<16x128xf32>, i32 -> vector<16x128xf32>
    %51 = arith.mulf %48, %31 : vector<16x128xf32>
    %52 = arith.mulf %47, %49 : vector<16x128xf32>
    %53 = arith.addf %51, %52 : vector<16x128xf32>
    %54 = math.tanh %53 : vector<16x128xf32>
    %55 = arith.mulf %50, %54 : vector<16x128xf32>
    %c2_i32 = arith.constant 2 : i32
    %56 = arith.index_cast %c2_i32 : i32 to index
    %c0_19 = arith.constant 0 : index
    %c0_20 = arith.constant 0 : index
    %57 = vector.load %arg2[%56, %c0_19, %c0_20] : memref<8x16x128xbf16, #tpu.memory_space<vmem>>, vector<1x16x128xbf16>
    %58 = vector.shape_cast %57 : vector<1x16x128xbf16> to vector<16x128xbf16>
    %59 = arith.extf %58 : vector<16x128xbf16> to vector<16x128xf32>
    %60 = arith.truncf %55 : vector<16x128xf32> to vector<16x128xbf16>
    %cst_21 = arith.constant dense<0.000000e+00> : vector<16x128xf32>
    %61 = tpu.matmul %60, %3, %cst_21 {dimension_numbers = #tpu.dot_dimension_numbers<[1], [0], [0], [1], [0, 0, 1, 1], [], []>} : vector<16x128xbf16>, vector<128x128xbf16>, vector<16x128xf32> -> vector<16x128xf32>
    %62 = arith.addf %59, %61 : vector<16x128xf32>
    %63 = math.tanh %62 : vector<16x128xf32>
    %64 = arith.negf %62 : vector<16x128xf32>
    %65 = math.exp %64 : vector<16x128xf32>
    %cst_22 = arith.constant 1.000000e+00 : f32
    %66 = vector.broadcast %cst_22 : f32 to vector<16x128xf32>
    %67 = arith.addf %66, %65 : vector<16x128xf32>
    %68 = arith.divf %66, %67 : vector<16x128xf32>
    %69 = arith.select %9, %63, %68 : vector<16x128xi1>, vector<16x128xf32>
    %c96_i32_23 = arith.constant 96 : i32
    %70 = tpu.dynamic_rotate %69 by %c96_i32_23 dim 1 : vector<16x128xf32>, i32 -> vector<16x128xf32>
    %c64_i32_24 = arith.constant 64 : i32
    %71 = tpu.dynamic_rotate %69 by %c64_i32_24 dim 1 : vector<16x128xf32>, i32 -> vector<16x128xf32>
    %c32_i32_25 = arith.constant 32 : i32
    %72 = tpu.dynamic_rotate %69 by %c32_i32_25 dim 1 : vector<16x128xf32>, i32 -> vector<16x128xf32>
    %73 = arith.mulf %70, %53 : vector<16x128xf32>
    %74 = arith.mulf %69, %71 : vector<16x128xf32>
    %75 = arith.addf %73, %74 : vector<16x128xf32>
    %76 = math.tanh %75 : vector<16x128xf32>
    %77 = arith.mulf %72, %76 : vector<16x128xf32>
    %c3_i32 = arith.constant 3 : i32
    %78 = arith.index_cast %c3_i32 : i32 to index
    %c0_26 = arith.constant 0 : index
    %c0_27 = arith.constant 0 : index
    %79 = vector.load %arg2[%78, %c0_26, %c0_27] : memref<8x16x128xbf16, #tpu.memory_space<vmem>>, vector<1x16x128xbf16>
    %80 = vector.shape_cast %79 : vector<1x16x128xbf16> to vector<16x128xbf16>
    %81 = arith.extf %80 : vector<16x128xbf16> to vector<16x128xf32>
    %82 = arith.truncf %77 : vector<16x128xf32> to vector<16x128xbf16>
    %cst_28 = arith.constant dense<0.000000e+00> : vector<16x128xf32>
    %83 = tpu.matmul %82, %3, %cst_28 {dimension_numbers = #tpu.dot_dimension_numbers<[1], [0], [0], [1], [0, 0, 1, 1], [], []>} : vector<16x128xbf16>, vector<128x128xbf16>, vector<16x128xf32> -> vector<16x128xf32>
    %84 = arith.addf %81, %83 : vector<16x128xf32>
    %85 = math.tanh %84 : vector<16x128xf32>
    %86 = arith.negf %84 : vector<16x128xf32>
    %87 = math.exp %86 : vector<16x128xf32>
    %cst_29 = arith.constant 1.000000e+00 : f32
    %88 = vector.broadcast %cst_29 : f32 to vector<16x128xf32>
    %89 = arith.addf %88, %87 : vector<16x128xf32>
    %90 = arith.divf %88, %89 : vector<16x128xf32>
    %91 = arith.select %9, %85, %90 : vector<16x128xi1>, vector<16x128xf32>
    %c96_i32_30 = arith.constant 96 : i32
    %92 = tpu.dynamic_rotate %91 by %c96_i32_30 dim 1 : vector<16x128xf32>, i32 -> vector<16x128xf32>
    %c64_i32_31 = arith.constant 64 : i32
    %93 = tpu.dynamic_rotate %91 by %c64_i32_31 dim 1 : vector<16x128xf32>, i32 -> vector<16x128xf32>
    %c32_i32_32 = arith.constant 32 : i32
    %94 = tpu.dynamic_rotate %91 by %c32_i32_32 dim 1 : vector<16x128xf32>, i32 -> vector<16x128xf32>
    %95 = arith.mulf %92, %75 : vector<16x128xf32>
    %96 = arith.mulf %91, %93 : vector<16x128xf32>
    %97 = arith.addf %95, %96 : vector<16x128xf32>
    %98 = math.tanh %97 : vector<16x128xf32>
    %99 = arith.mulf %94, %98 : vector<16x128xf32>
    %c4_i32 = arith.constant 4 : i32
    %100 = arith.index_cast %c4_i32 : i32 to index
    %c0_33 = arith.constant 0 : index
    %c0_34 = arith.constant 0 : index
    %101 = vector.load %arg2[%100, %c0_33, %c0_34] : memref<8x16x128xbf16, #tpu.memory_space<vmem>>, vector<1x16x128xbf16>
    %102 = vector.shape_cast %101 : vector<1x16x128xbf16> to vector<16x128xbf16>
    %103 = arith.extf %102 : vector<16x128xbf16> to vector<16x128xf32>
    %104 = arith.truncf %99 : vector<16x128xf32> to vector<16x128xbf16>
    %cst_35 = arith.constant dense<0.000000e+00> : vector<16x128xf32>
    %105 = tpu.matmul %104, %3, %cst_35 {dimension_numbers = #tpu.dot_dimension_numbers<[1], [0], [0], [1], [0, 0, 1, 1], [], []>} : vector<16x128xbf16>, vector<128x128xbf16>, vector<16x128xf32> -> vector<16x128xf32>
    %106 = arith.addf %103, %105 : vector<16x128xf32>
    %107 = math.tanh %106 : vector<16x128xf32>
    %108 = arith.negf %106 : vector<16x128xf32>
    %109 = math.exp %108 : vector<16x128xf32>
    %cst_36 = arith.constant 1.000000e+00 : f32
    %110 = vector.broadcast %cst_36 : f32 to vector<16x128xf32>
    %111 = arith.addf %110, %109 : vector<16x128xf32>
    %112 = arith.divf %110, %111 : vector<16x128xf32>
    %113 = arith.select %9, %107, %112 : vector<16x128xi1>, vector<16x128xf32>
    %c96_i32_37 = arith.constant 96 : i32
    %114 = tpu.dynamic_rotate %113 by %c96_i32_37 dim 1 : vector<16x128xf32>, i32 -> vector<16x128xf32>
    %c64_i32_38 = arith.constant 64 : i32
    %115 = tpu.dynamic_rotate %113 by %c64_i32_38 dim 1 : vector<16x128xf32>, i32 -> vector<16x128xf32>
    %c32_i32_39 = arith.constant 32 : i32
    %116 = tpu.dynamic_rotate %113 by %c32_i32_39 dim 1 : vector<16x128xf32>, i32 -> vector<16x128xf32>
    %117 = arith.mulf %114, %97 : vector<16x128xf32>
    %118 = arith.mulf %113, %115 : vector<16x128xf32>
    %119 = arith.addf %117, %118 : vector<16x128xf32>
    %120 = math.tanh %119 : vector<16x128xf32>
    %121 = arith.mulf %116, %120 : vector<16x128xf32>
    %c5_i32 = arith.constant 5 : i32
    %122 = arith.index_cast %c5_i32 : i32 to index
    %c0_40 = arith.constant 0 : index
    %c0_41 = arith.constant 0 : index
    %123 = vector.load %arg2[%122, %c0_40, %c0_41] : memref<8x16x128xbf16, #tpu.memory_space<vmem>>, vector<1x16x128xbf16>
    %124 = vector.shape_cast %123 : vector<1x16x128xbf16> to vector<16x128xbf16>
    %125 = arith.extf %124 : vector<16x128xbf16> to vector<16x128xf32>
    %126 = arith.truncf %121 : vector<16x128xf32> to vector<16x128xbf16>
    %cst_42 = arith.constant dense<0.000000e+00> : vector<16x128xf32>
    %127 = tpu.matmul %126, %3, %cst_42 {dimension_numbers = #tpu.dot_dimension_numbers<[1], [0], [0], [1], [0, 0, 1, 1], [], []>} : vector<16x128xbf16>, vector<128x128xbf16>, vector<16x128xf32> -> vector<16x128xf32>
    %128 = arith.addf %125, %127 : vector<16x128xf32>
    %129 = math.tanh %128 : vector<16x128xf32>
    %130 = arith.negf %128 : vector<16x128xf32>
    %131 = math.exp %130 : vector<16x128xf32>
    %cst_43 = arith.constant 1.000000e+00 : f32
    %132 = vector.broadcast %cst_43 : f32 to vector<16x128xf32>
    %133 = arith.addf %132, %131 : vector<16x128xf32>
    %134 = arith.divf %132, %133 : vector<16x128xf32>
    %135 = arith.select %9, %129, %134 : vector<16x128xi1>, vector<16x128xf32>
    %c96_i32_44 = arith.constant 96 : i32
    %136 = tpu.dynamic_rotate %135 by %c96_i32_44 dim 1 : vector<16x128xf32>, i32 -> vector<16x128xf32>
    %c64_i32_45 = arith.constant 64 : i32
    %137 = tpu.dynamic_rotate %135 by %c64_i32_45 dim 1 : vector<16x128xf32>, i32 -> vector<16x128xf32>
    %c32_i32_46 = arith.constant 32 : i32
    %138 = tpu.dynamic_rotate %135 by %c32_i32_46 dim 1 : vector<16x128xf32>, i32 -> vector<16x128xf32>
    %139 = arith.mulf %136, %119 : vector<16x128xf32>
    %140 = arith.mulf %135, %137 : vector<16x128xf32>
    %141 = arith.addf %139, %140 : vector<16x128xf32>
    %142 = math.tanh %141 : vector<16x128xf32>
    %143 = arith.mulf %138, %142 : vector<16x128xf32>
    %c6_i32 = arith.constant 6 : i32
    %144 = arith.index_cast %c6_i32 : i32 to index
    %c0_47 = arith.constant 0 : index
    %c0_48 = arith.constant 0 : index
    %145 = vector.load %arg2[%144, %c0_47, %c0_48] : memref<8x16x128xbf16, #tpu.memory_space<vmem>>, vector<1x16x128xbf16>
    %146 = vector.shape_cast %145 : vector<1x16x128xbf16> to vector<16x128xbf16>
    %147 = arith.extf %146 : vector<16x128xbf16> to vector<16x128xf32>
    %148 = arith.truncf %143 : vector<16x128xf32> to vector<16x128xbf16>
    %cst_49 = arith.constant dense<0.000000e+00> : vector<16x128xf32>
    %149 = tpu.matmul %148, %3, %cst_49 {dimension_numbers = #tpu.dot_dimension_numbers<[1], [0], [0], [1], [0, 0, 1, 1], [], []>} : vector<16x128xbf16>, vector<128x128xbf16>, vector<16x128xf32> -> vector<16x128xf32>
    %150 = arith.addf %147, %149 : vector<16x128xf32>
    %151 = math.tanh %150 : vector<16x128xf32>
    %152 = arith.negf %150 : vector<16x128xf32>
    %153 = math.exp %152 : vector<16x128xf32>
    %cst_50 = arith.constant 1.000000e+00 : f32
    %154 = vector.broadcast %cst_50 : f32 to vector<16x128xf32>
    %155 = arith.addf %154, %153 : vector<16x128xf32>
    %156 = arith.divf %154, %155 : vector<16x128xf32>
    %157 = arith.select %9, %151, %156 : vector<16x128xi1>, vector<16x128xf32>
    %c96_i32_51 = arith.constant 96 : i32
    %158 = tpu.dynamic_rotate %157 by %c96_i32_51 dim 1 : vector<16x128xf32>, i32 -> vector<16x128xf32>
    %c64_i32_52 = arith.constant 64 : i32
    %159 = tpu.dynamic_rotate %157 by %c64_i32_52 dim 1 : vector<16x128xf32>, i32 -> vector<16x128xf32>
    %c32_i32_53 = arith.constant 32 : i32
    %160 = tpu.dynamic_rotate %157 by %c32_i32_53 dim 1 : vector<16x128xf32>, i32 -> vector<16x128xf32>
    %161 = arith.mulf %158, %141 : vector<16x128xf32>
    %162 = arith.mulf %157, %159 : vector<16x128xf32>
    %163 = arith.addf %161, %162 : vector<16x128xf32>
    %164 = math.tanh %163 : vector<16x128xf32>
    %165 = arith.mulf %160, %164 : vector<16x128xf32>
    %c7_i32 = arith.constant 7 : i32
    %166 = arith.index_cast %c7_i32 : i32 to index
    %c0_54 = arith.constant 0 : index
    %c0_55 = arith.constant 0 : index
    %167 = vector.load %arg2[%166, %c0_54, %c0_55] : memref<8x16x128xbf16, #tpu.memory_space<vmem>>, vector<1x16x128xbf16>
    %168 = vector.shape_cast %167 : vector<1x16x128xbf16> to vector<16x128xbf16>
    %169 = arith.extf %168 : vector<16x128xbf16> to vector<16x128xf32>
    %170 = arith.truncf %165 : vector<16x128xf32> to vector<16x128xbf16>
    %cst_56 = arith.constant dense<0.000000e+00> : vector<16x128xf32>
    %171 = tpu.matmul %170, %3, %cst_56 {dimension_numbers = #tpu.dot_dimension_numbers<[1], [0], [0], [1], [0, 0, 1, 1], [], []>} : vector<16x128xbf16>, vector<128x128xbf16>, vector<16x128xf32> -> vector<16x128xf32>
    %172 = arith.addf %169, %171 : vector<16x128xf32>
    %173 = math.tanh %172 : vector<16x128xf32>
    %174 = arith.negf %172 : vector<16x128xf32>
    %175 = math.exp %174 : vector<16x128xf32>
    %cst_57 = arith.constant 1.000000e+00 : f32
    %176 = vector.broadcast %cst_57 : f32 to vector<16x128xf32>
    %177 = arith.addf %176, %175 : vector<16x128xf32>
    %178 = arith.divf %176, %177 : vector<16x128xf32>
    %179 = arith.select %9, %173, %178 : vector<16x128xi1>, vector<16x128xf32>
    %c96_i32_58 = arith.constant 96 : i32
    %180 = tpu.dynamic_rotate %179 by %c96_i32_58 dim 1 : vector<16x128xf32>, i32 -> vector<16x128xf32>
    %c64_i32_59 = arith.constant 64 : i32
    %181 = tpu.dynamic_rotate %179 by %c64_i32_59 dim 1 : vector<16x128xf32>, i32 -> vector<16x128xf32>
    %c32_i32_60 = arith.constant 32 : i32
    %182 = tpu.dynamic_rotate %179 by %c32_i32_60 dim 1 : vector<16x128xf32>, i32 -> vector<16x128xf32>
    %183 = arith.mulf %180, %163 : vector<16x128xf32>
    %184 = arith.mulf %179, %181 : vector<16x128xf32>
    %185 = arith.addf %183, %184 : vector<16x128xf32>
    %186 = math.tanh %185 : vector<16x128xf32>
    %187 = arith.mulf %182, %186 : vector<16x128xf32>
    %c8_i32 = arith.constant 8 : i32
    %c0_61 = arith.constant 0 : index
    %c0_62 = arith.constant 0 : index
    %188 = vector.load %arg9[%c0_61, %c0_62] : memref<16x128xf32, #tpu.memory_space<vmem>>, vector<16x128xf32>
    tpu.vector_store %arg9[%c0_61, %c0_62], %187 {strides = array<i32>} : memref<16x128xf32, #tpu.memory_space<vmem>>, vector<16x128xf32>,
    %c0_63 = arith.constant 0 : index
    %c0_64 = arith.constant 0 : index
    %189 = vector.load %arg10[%c0_63, %c0_64] : memref<16x128xf32, #tpu.memory_space<vmem>>, vector<16x128xf32>
    tpu.vector_store %arg10[%c0_63, %c0_64], %185 {strides = array<i32>} : memref<16x128xf32, #tpu.memory_space<vmem>>, vector<16x128xf32>,
    %c0_i32_65 = arith.constant 0 : i32
    %190 = arith.cmpi eq, %arg1, %c0_i32_65 : i32
    %191 = arith.extui %190 : i1 to i32
    %c0_i32_66 = arith.constant 0 : i32
    %192 = arith.cmpi ne, %191, %c0_i32_66 : i32
    scf.if %192 {
      %c0_67 = arith.constant 0 : index
      %c0_68 = arith.constant 0 : index
      %193 = vector.load %arg4[%c0_67, %c0_68] : memref<128x128xf32, #tpu.memory_space<vmem>>, vector<128x128xf32>
      %cst_69 = arith.constant dense<0.000000e+00> : vector<16x128xf32>
      %194 = tpu.matmul %187, %193, %cst_69 {dimension_numbers = #tpu.dot_dimension_numbers<[1], [0], [0], [1], [0, 0, 1, 1], [], []>} : vector<16x128xf32>, vector<128x128xf32>, vector<16x128xf32> -> vector<16x128xf32>
      %c0_70 = arith.constant 0 : index
      %c0_71 = arith.constant 0 : index
      %195 = vector.load %arg5[%c0_70, %c0_71] : memref<1x128xf32, #tpu.memory_space<vmem>>, vector<1x128xf32>
      %196 = vector.broadcast %195 : vector<1x128xf32> to vector<16x128xf32>
      %197 = arith.addf %194, %196 : vector<16x128xf32>
      %cst_72 = arith.constant 0.000000e+00 : f32
      %198 = vector.broadcast %cst_72 : f32 to vector<16x128xf32>
      %199 = arith.maximumf %197, %198 : vector<16x128xf32>
      %c0_73 = arith.constant 0 : index
      %c0_74 = arith.constant 0 : index
      %200 = vector.load %arg6[%c0_73, %c0_74] : memref<128x128xf32, #tpu.memory_space<vmem>>, vector<128x128xf32>
      %cst_75 = arith.constant dense<0.000000e+00> : vector<16x128xf32>
      %201 = tpu.matmul %199, %200, %cst_75 {dimension_numbers = #tpu.dot_dimension_numbers<[1], [0], [0], [1], [0, 0, 1, 1], [], []>} : vector<16x128xf32>, vector<128x128xf32>, vector<16x128xf32> -> vector<16x128xf32>
      %c0_76 = arith.constant 0 : index
      %c0_77 = arith.constant 0 : index
      %202 = vector.load %arg7[%c0_76, %c0_77] : memref<1x128xf32, #tpu.memory_space<vmem>>, vector<1x128xf32>
      %203 = vector.broadcast %202 : vector<1x128xf32> to vector<16x128xf32>
      %204 = arith.addf %201, %203 : vector<16x128xf32>
      %cst_78 = arith.constant dense<0xFF800000> : vector<16xf32>
      %205 = vector.multi_reduction <maximumf>, %204, %cst_78 [1] : vector<16x128xf32> to vector<16xf32>
      %206 = vector.shape_cast %205 : vector<16xf32> to vector<16x1xf32>
      %207 = vector.broadcast %206 : vector<16x1xf32> to vector<16x128xf32>
      %208 = arith.subf %204, %207 : vector<16x128xf32>
      %209 = math.exp %208 : vector<16x128xf32>
      %cst_79 = arith.constant dense<0.000000e+00> : vector<16xf32>
      %210 = vector.multi_reduction <add>, %209, %cst_79 [1] : vector<16x128xf32> to vector<16xf32>
      %211 = vector.shape_cast %210 : vector<16xf32> to vector<16x1xf32>
      %212 = math.log %211 : vector<16x1xf32>
      %213 = vector.broadcast %212 : vector<16x1xf32> to vector<16x128xf32>
      %214 = arith.subf %208, %213 : vector<16x128xf32>
      %c0_80 = arith.constant 0 : index
      %c0_81 = arith.constant 0 : index
      %215 = vector.load %arg8[%c0_80, %c0_81] : memref<16x128xf32, #tpu.memory_space<vmem>>, vector<16x128xf32>
      tpu.vector_store %arg8[%c0_80, %c0_81], %214 {strides = array<i32>} : memref<16x128xf32, #tpu.memory_space<vmem>>, vector<16x128xf32>,
    } else {
    }
    return
  }
  func.func @transform_0(%arg0: i32, %arg1: i32) -> (i32, i32, i32) {
    %c0_i32 = arith.constant 0 : i32
    %c0_i32_0 = arith.constant 0 : i32
    return %arg1, %arg0, %c0_i32 : i32, i32, i32
  }
  func.func @transform_1(%arg0: i32, %arg1: i32) -> (i32, i32) {
    %c0_i32 = arith.constant 0 : i32
    %c0_i32_0 = arith.constant 0 : i32
    %c0_i32_1 = arith.constant 0 : i32
    return %c0_i32, %c0_i32_0 : i32, i32
  }
  func.func @transform_2(%arg0: i32, %arg1: i32) -> (i32, i32) {
    %c0_i32 = arith.constant 0 : i32
    %c0_i32_0 = arith.constant 0 : i32
    %c0_i32_1 = arith.constant 0 : i32
    return %c0_i32, %c0_i32_0 : i32, i32
  }
  func.func @transform_3(%arg0: i32, %arg1: i32) -> (i32, i32) {
    %c0_i32 = arith.constant 0 : i32
    %c0_i32_0 = arith.constant 0 : i32
    %c0_i32_1 = arith.constant 0 : i32
    return %c0_i32, %c0_i32_0 : i32, i32
  }
  func.func @transform_4(%arg0: i32, %arg1: i32) -> (i32, i32) {
    %c0_i32 = arith.constant 0 : i32
    %c0_i32_0 = arith.constant 0 : i32
    %c0_i32_1 = arith.constant 0 : i32
    return %c0_i32, %c0_i32_0 : i32, i32
  }
  func.func @transform_5(%arg0: i32, %arg1: i32) -> (i32, i32) {
    %c0_i32 = arith.constant 0 : i32
    %c0_i32_0 = arith.constant 0 : i32
    %c0_i32_1 = arith.constant 0 : i32
    return %c0_i32, %c0_i32_0 : i32, i32
  }
  func.func @transform_6(%arg0: i32, %arg1: i32) -> (i32, i32) {
    %c0_i32 = arith.constant 0 : i32
    %c0_i32_0 = arith.constant 0 : i32
    return %arg0, %c0_i32 : i32, i32
  }
}

</mosaic_0001>

<bundles_post_ra>
// kernel: who_rapped_it_forward.1
= control target key start
LH: loop header
LB: loop body
LE: loop exit
PB: predicated region body
PF: predicated region fallthrough
CT: control target
= control target key end

     0   :  { %v1662_v0 = vmov 0.0   ;;  %vm1663_vm0 = vmmov 0   ;;  %v1664_v9 = vmov 0.0|0.0   ;;  %v48_v22 = vlaneseq  ;;  %s1665_s14 = smov 64   ;;  %s1666_s15 = smov 96   ;;  %s2151_s1 = inlined_call_operand.vmem [shape: bf16[128,128], index: 1, kind: input, shape index: {}]   ;;  %s2152_s0 = inlined_call_operand.vmem [shape: bf16[8,16,128], index: 0, kind: input, shape index: {}]   ;;  %s2153_s2 = inlined_call_operand.vmem [shape: f32[128,128], index: 2, kind: input, shape index: {}]   ;;  %s2154_s4 = inlined_call_operand.vmem [shape: f32[128,128], index: 4, kind: input, shape index: {}]   ;;  %s2155_s3 = inlined_call_operand.vmem [shape: f32[1,128], index: 3, kind: input, shape index: {}]   ;;  %s2156_s5 = inlined_call_operand.vmem [shape: f32[1,128], index: 5, kind: input, shape index: {}]   ;;  %s2157_s6 = inlined_call_operand.vmem [shape: f32[16,128], index: 6, kind: output, shape index: {}]  }
   0x1   :  { %1218 = vmatprep.subr.bf16.mxu0 %v1662_v0  ;;  %v1707_v1 = vld [vmem:[%s2151_s1] sm:$0xff]   ;;  %1234 = vmatprep.mubr.msk.bf16.mxu0 %vm1663_vm0, %v1662_v0  ;;  %v1718_v2 = vld [vmem:[%s2151_s1 + $0x8] sm:$0xff]   ;;  %v1727_v3 = vld [vmem:[%s2151_s1 + $0x10] sm:$0xff]   ;;  %s1667_s16 = smov 32  }
   0x2   :  { %1238 = vmatprep.subr.bf16.mxu1 %v1662_v0  ;;  %1254 = vmatprep.mubr.msk.bf16.mxu1 %vm1663_vm0, %v1662_v0  ;;  %v1736_v4 = vld [vmem:[%s2151_s1 + $0x18] sm:$0xff]   ;;  %v1745_v5 = vld [vmem:[%s2151_s1 + $0x20] sm:$0xff]   ;;  %v1754_v6 = vld [vmem:[%s2151_s1 + $0x28] sm:$0xff]   ;;  %v49_v26 = vand.u32 127, %v48_v22 }
   0x3   :  { %1219 = vmatpush3.bf16.msra.mxu0 %v1707_v1  ;;  %1239 = vmatpush3.bf16.msra.mxu1 %v1707_v1  ;;  %v1763_v7 = vld [vmem:[%s2151_s1 + $0x30] sm:$0xff]   ;;  %v1772_v8 = vld [vmem:[%s2151_s1 + $0x38] sm:$0xff]   ;;  %v1072_v10 = vld [vmem:[%s2152_s0] sm:$0xff]  }
   0x4   :  { %1220 = vmatprep.subr.bf16.mxu0 %v1662_v0  ;;  %1240 = vmatprep.subr.bf16.mxu1 %v1662_v0  ;;  %v1073_v11 = vunpack.c.l.bf16 %v1072_v10  ;;  %v1074_v12 = vunpack.c.h.bf16 %v1072_v10  ;;  %vm50_vm1 = vcmp.ge.s32.totalorder %v49_v26, 64  ;;  %vm51_vm2 = vcmp.lt.s32.totalorder %v49_v26, 96  ;;  %v1103_v51 = vld [vmem:[%s2152_s0 + $0x8] sm:$0xff]  }
   0x5   :  { %vm1802_vm3 = vmand %vm50_vm1, %vm51_vm2  ;;  %v1077_v52 = vunpack.c.l.bf16 %v1103_v51  ;;  %v1078_v53 = vunpack.c.h.bf16 %v1103_v51  ;;  %v908_v27 = vld [vmem:[%s2154_s4 + $0x8] sm:$0xff] }
   0x7   :  { %1221 = vmatpush3.bf16.msra.mxu0 %v1718_v2  ;;  %1241 = vmatpush3.bf16.msra.mxu1 %v1718_v2 }
   0x8   :  { %1222 = vmatprep.subr.bf16.mxu0 %v1662_v0  ;;  %1242 = vmatprep.subr.bf16.mxu1 %v1662_v0 }
   0xb   :  { %1223 = vmatpush3.bf16.msra.mxu0 %v1727_v3  ;;  %1243 = vmatpush3.bf16.msra.mxu1 %v1727_v3 }
   0xc   :  { %1224 = vmatprep.subr.bf16.mxu0 %v1662_v0  ;;  %1244 = vmatprep.subr.bf16.mxu1 %v1662_v0 }
   0xf   :  { %1225 = vmatpush3.bf16.msra.mxu0 %v1736_v4  ;;  %1245 = vmatpush3.bf16.msra.mxu1 %v1736_v4 }
  0x10   :  { %1226 = vmatprep.subr.bf16.mxu0 %v1662_v0  ;;  %1246 = vmatprep.subr.bf16.mxu1 %v1662_v0 }
  0x13   :  { %1227 = vmatpush3.bf16.msra.mxu0 %v1745_v5  ;;  %1247 = vmatpush3.bf16.msra.mxu1 %v1745_v5 }
  0x14   :  { %1228 = vmatprep.subr.bf16.mxu0 %v1662_v0  ;;  %1248 = vmatprep.subr.bf16.mxu1 %v1662_v0 }
  0x17   :  { %1229 = vmatpush3.bf16.msra.mxu0 %v1754_v6  ;;  %1249 = vmatpush3.bf16.msra.mxu1 %v1754_v6 }
  0x18   :  { %1230 = vmatprep.subr.bf16.mxu0 %v1662_v0  ;;  %1250 = vmatprep.subr.bf16.mxu1 %v1662_v0 }
  0x1b   :  { %1231 = vmatpush3.bf16.msra.mxu0 %v1763_v7  ;;  %1251 = vmatpush3.bf16.msra.mxu1 %v1763_v7 }
  0x1c   :  { %1232 = vmatprep.subr.bf16.mxu0 %v1662_v0  ;;  %1252 = vmatprep.subr.bf16.mxu1 %v1662_v0 }
  0x1f   :  { %1233 = vmatpush3.bf16.msra.mxu0 %v1772_v8  ;;  %1253 = vmatpush3.bf16.msra.mxu1 %v1772_v8 }
  0x20   :  { %1258 = vmatprep.subr.bf16.mxu0 %v1662_v0  ;;  %1278 = vmatprep.subr.bf16.mxu1 %v1662_v0 }
  0x22   :  { %1235 = vmatmul.mubr.bf16.vlgmr.msra.gmra.mrb[0].mxu0 %v1664_v9 }
  0x23   :  { %1259 = vmatpush3.bf16.msra.mxu0 %v1707_v1  ;;  %1274 = vmatprep.mubr.msk.bf16.mxu0 %vm1663_vm0, %v1662_v0 }
  0x24   :  { %1260 = vmatprep.subr.bf16.mxu0 %v1662_v0 }
  0x27   :  { %1261 = vmatpush3.bf16.msra.mxu0 %v1718_v2 }
  0x28   :  { %1262 = vmatprep.subr.bf16.mxu0 %v1662_v0 }
  0x2b   :  { %1263 = vmatpush3.bf16.msra.mxu0 %v1727_v3 }
  0x2c   :  { %1264 = vmatprep.subr.bf16.mxu0 %v1662_v0 }
  0x2f   :  { %1265 = vmatpush3.bf16.msra.mxu0 %v1736_v4 }
  0x30   :  { %1266 = vmatprep.subr.bf16.mxu0 %v1662_v0 }
  0x33   :  { %1267 = vmatpush3.bf16.msra.mxu0 %v1745_v5 }
  0x34   :  { %1268 = vmatprep.subr.bf16.mxu0 %v1662_v0 }
  0x37   :  { %1269 = vmatpush3.bf16.msra.mxu0 %v1754_v6 }
  0x38   :  { %1270 = vmatprep.subr.bf16.mxu0 %v1662_v0 }
  0x3b   :  { %1271 = vmatpush3.bf16.msra.mxu0 %v1763_v7 }
  0x3c   :  { %1272 = vmatprep.subr.bf16.mxu0 %v1662_v0 }
  0x3f   :  { %1273 = vmatpush3.bf16.msra.mxu0 %v1772_v8 }
  0x40   :  { %1298 = vmatprep.subr.bf16.mxu0 %v1662_v0 }
  0xf5   :  { %v144_v13 = vpop.f32.mrb[0].mxu0 }
  0xf6   :  { %v151_v14 = vadd.f32 %v1073_v11, %v144_v13  ;;  %v1236_v15 = vpop.f32.mrb[1].mxu0 }
  0xf7   :  { %v147_v16 = vpop.f32.mrb[2].mxu0 }
  0xf8   :  { %v1039_v17 = vmul.f32 -1.442695, %v151_v14  ;;  %v152_v18 = vadd.f32 %v1074_v12, %v147_v16  ;;  %v1237_v19 = vpop.f32.mrb[3].mxu0 }
  0xfa   :  { %1526 = vpow2.f32 %v1039_v17  ;;  %v1040_v20 = vmul.f32 -1.442695, %v152_v18 }
  0xfc   :  { %1528 = vpow2.f32 %v1040_v20 }
  0xfd   :  { %1530 = vtanh.f32 %v151_v14 }
 0x104   :  { %v1527_v21 = vpop.eup %1526 }
 0x105   :  { %v161_v23 = vadd.f32 1.0, %v1527_v21 }
 0x106   :  { %v1529_v24 = vpop.eup %1528 }
 0x107   :  { %1532 = vrcp.f32 %v161_v23  ;;  %v162_v25 = vadd.f32 1.0, %v1529_v24  ;;  %v1531_v28 = vpop.eup %1530 }
 0x109   :  { %1534 = vrcp.f32 %v162_v25 }
 0x10a   :  { %1536 = vtanh.f32 %v152_v18 }
 0x111   :  { %v1533_v29 = vpop.eup %1532 }
 0x112   :  { %v167_v30 = vsel %vm1802_vm3, %v1531_v28, %v1533_v29 }
 0x113   :  { %v1535_v31 = vpop.eup %1534  ;;  %173 = vrot.lane.b32.xlu1 %v167_v30, %s1665_s14  ;;  %169 = vrot.lane.b32.xlu0 %v167_v30, %s1666_s15 }
 0x114   :  { %v1537_v32 = vpop.eup %1536 }
 0x115   :  { %v168_v33 = vsel %vm1802_vm3, %v1537_v32, %v1535_v31 }
 0x117   :  { %175 = vrot.lane.b32.xlu1 %v168_v33, %s1665_s14  ;;  %171 = vrot.lane.b32.xlu0 %v168_v33, %s1666_s15 }
 0x11b   :  { %179 = vrot.lane.b32.xlu1 %v168_v33, %s1667_s16  ;;  %177 = vrot.lane.b32.xlu0 %v167_v30, %s1667_s16 }
 0x185   :  { %v174_v34 = vpop.permute.xlu1 %173  ;;  %v170_v35 = vpop.permute.xlu0 %169 }
 0x186   :  { %v183_v36 = vmul.f32 %v174_v34, %v167_v30  ;;  %v181_v37 = vmul.f32 0.0, %v170_v35  ;;  %v1104_v35 = vld [vmem:[%s2152_s0 + $0x10] sm:$0xff]  }
 0x188   :  { %v1816_v38 = vadd.f32 %v183_v36, %v181_v37  ;;  %v1081_v36 = vunpack.c.l.bf16 %v1104_v35  ;;  %v1082_v37 = vunpack.c.h.bf16 %v1104_v35 }
 0x189   :  { %v176_v39 = vpop.permute.xlu1 %175  ;;  %v172_v40 = vpop.permute.xlu0 %171 }
 0x18a   :  { %v184_v41 = vmul.f32 %v176_v39, %v168_v33  ;;  %v182_v42 = vmul.f32 0.0, %v172_v40  ;;  %1538 = vtanh.f32 %v1816_v38 }
 0x18c   :  { %v1819_v43 = vadd.f32 %v184_v41, %v182_v42 }
 0x18d   :  { %v180_v46 = vpop.permute.xlu1 %179  ;;  %v178_v47 = vpop.permute.xlu0 %177 }
 0x18e   :  { %1540 = vtanh.f32 %v1819_v43 }
 0x194   :  { %v1539_v44 = vpop.eup %1538 }
 0x195   :  { %v189_v49 = vmul.f32 %v1539_v44, %v178_v47 }
 0x198   :  { %v1541_v45 = vpop.eup %1540 }
 0x199   :  { %v190_v48 = vmul.f32 %v1541_v45, %v180_v46 }
 0x19b   :  { %v196_v50 = vpack.c.bf16 %v190_v48, %v189_v49 }
 0x19d   :  { %1255 = vmatmul.mubr.bf16.vlgmr.msra.gmra.mrb[0].mxu1 %v196_v50 }
 0x19e   :  { %1279 = vmatpush3.bf16.msra.mxu1 %v1707_v1  ;;  %1294 = vmatprep.mubr.msk.bf16.mxu1 %vm1663_vm0, %v1662_v0 }
 0x19f   :  { %1280 = vmatprep.subr.bf16.mxu1 %v1662_v0 }
 0x1a2   :  { %1281 = vmatpush3.bf16.msra.mxu1 %v1718_v2 }
 0x1a3   :  { %1282 = vmatprep.subr.bf16.mxu1 %v1662_v0 }
 0x1a6   :  { %1283 = vmatpush3.bf16.msra.mxu1 %v1727_v3 }
 0x1a7   :  { %1284 = vmatprep.subr.bf16.mxu1 %v1662_v0 }
 0x1aa   :  { %1285 = vmatpush3.bf16.msra.mxu1 %v1736_v4 }
 0x1ab   :  { %1286 = vmatprep.subr.bf16.mxu1 %v1662_v0 }
 0x1ae   :  { %1287 = vmatpush3.bf16.msra.mxu1 %v1745_v5 }
 0x1af   :  { %1288 = vmatprep.subr.bf16.mxu1 %v1662_v0 }
 0x1b2   :  { %1289 = vmatpush3.bf16.msra.mxu1 %v1754_v6 }
 0x1b3   :  { %1290 = vmatprep.subr.bf16.mxu1 %v1662_v0 }
 0x1b6   :  { %1291 = vmatpush3.bf16.msra.mxu1 %v1763_v7 }
 0x1b7   :  { %1292 = vmatprep.subr.bf16.mxu1 %v1662_v0 }
 0x1ba   :  { %1293 = vmatpush3.bf16.msra.mxu1 %v1772_v8 }
 0x1bb   :  { %1318 = vmatprep.subr.bf16.mxu1 %v1662_v0 }
 0x270   :  { %v231_v54 = vpop.f32.mrb[0].mxu1 }
 0x271   :  { %v238_v55 = vadd.f32 %v1077_v52, %v231_v54  ;;  %v1256_v56 = vpop.f32.mrb[1].mxu1 }
 0x272   :  { %v234_v57 = vpop.f32.mrb[2].mxu1 }
 0x273   :  { %v1043_v58 = vmul.f32 -1.442695, %v238_v55  ;;  %v239_v59 = vadd.f32 %v1078_v53, %v234_v57  ;;  %v1257_v60 = vpop.f32.mrb[3].mxu1 }
 0x275   :  { %1542 = vpow2.f32 %v1043_v58  ;;  %v1044_v61 = vmul.f32 -1.442695, %v239_v59 }
 0x277   :  { %1544 = vpow2.f32 %v1044_v61 }
 0x278   :  { %1546 = vtanh.f32 %v238_v55 }
 0x27f   :  { %v1543_v62 = vpop.eup %1542 }
 0x280   :  { %v248_v63 = vadd.f32 1.0, %v1543_v62 }
 0x281   :  { %v1545_v9 = vpop.eup %1544 }
 0x282   :  { %1548 = vrcp.f32 %v248_v63  ;;  %v249_v10 = vadd.f32 1.0, %v1545_v9  ;;  %v1547_v11 = vpop.eup %1546 }
 0x283   :  { %1550 = vtanh.f32 %v239_v59 }
 0x284   :  { %1552 = vrcp.f32 %v249_v10 }
 0x28c   :  { %v1549_v12 = vpop.eup %1548 }
 0x28d   :  { %v1551_v13 = vpop.eup %1550  ;;  %v254_v14 = vsel %vm1802_vm3, %v1547_v11, %v1549_v12 }
 0x28e   :  { %v1553_v15 = vpop.eup %1552  ;;  %256 = vrot.lane.b32.xlu0 %v254_v14, %s1666_s15 }
 0x28f   :  { %v255_v16 = vsel %vm1802_vm3, %v1551_v13, %v1553_v15 }
 0x290   :  { %258 = vrot.lane.b32.xlu1 %v255_v16, %s1666_s15 }
 0x292   :  { %260 = vrot.lane.b32.xlu0 %v254_v14, %s1665_s14 }
 0x294   :  { %262 = vrot.lane.b32.xlu1 %v255_v16, %s1665_s14 }
 0x296   :  { %264 = vrot.lane.b32.xlu0 %v254_v14, %s1667_s16 }
 0x298   :  { %266 = vrot.lane.b32.xlu1 %v255_v16, %s1667_s16 }
 0x300   :  { %v257_v17 = vpop.permute.xlu0 %256 }
 0x301   :  { %v268_v20 = vmul.f32 %v257_v17, %v1816_v38 }
 0x302   :  { %v259_v18 = vpop.permute.xlu1 %258 }
 0x303   :  { %v269_v23 = vmul.f32 %v259_v18, %v1819_v43  ;;  %v1105_v18 = vld [vmem:[%s2152_s0 + $0x18] sm:$0xff]  }
 0x304   :  { %v261_v19 = vpop.permute.xlu0 %260 }
 0x305   :  { %v270_v21 = vmul.f32 %v261_v19, %v254_v14  ;;  %v1085_v19 = vunpack.c.l.bf16 %v1105_v18 }
 0x306   :  { %v263_v22 = vpop.permute.xlu1 %262 }
 0x307   :  { %v1855_v24 = vadd.f32 %v270_v21, %v268_v20  ;;  %v271_v25 = vmul.f32 %v263_v22, %v255_v16  ;;  %v1086_v20 = vunpack.c.h.bf16 %v1105_v18 }
 0x308   :  { %v265_v30 = vpop.permute.xlu0 %264 }
 0x309   :  { %1554 = vtanh.f32 %v1855_v24  ;;  %v1858_v26 = vadd.f32 %v271_v25, %v269_v23 }
 0x30a   :  { %v267_v31 = vpop.permute.xlu1 %266 }
 0x30b   :  { %1556 = vtanh.f32 %v1858_v26 }
 0x313   :  { %v1555_v28 = vpop.eup %1554 }
 0x314   :  { %v276_v32 = vmul.f32 %v1555_v28, %v265_v30 }
 0x315   :  { %v1557_v29 = vpop.eup %1556 }
 0x316   :  { %v277_v33 = vmul.f32 %v1557_v29, %v267_v31 }
 0x318   :  { %v283_v34 = vpack.c.bf16 %v277_v33, %v276_v32 }
 0x31a   :  { %1275 = vmatmul.mubr.bf16.vlgmr.msra.gmra.mrb[4].mxu0 %v283_v34 }
 0x31b   :  { %1299 = vmatpush3.bf16.msra.mxu0 %v1707_v1  ;;  %1314 = vmatprep.mubr.msk.bf16.mxu0 %vm1663_vm0, %v1662_v0 }
 0x31c   :  { %1300 = vmatprep.subr.bf16.mxu0 %v1662_v0 }
 0x31f   :  { %1301 = vmatpush3.bf16.msra.mxu0 %v1718_v2 }
 0x320   :  { %1302 = vmatprep.subr.bf16.mxu0 %v1662_v0 }
 0x323   :  { %1303 = vmatpush3.bf16.msra.mxu0 %v1727_v3 }
 0x324   :  { %1304 = vmatprep.subr.bf16.mxu0 %v1662_v0 }
 0x327   :  { %1305 = vmatpush3.bf16.msra.mxu0 %v1736_v4 }
 0x328   :  { %1306 = vmatprep.subr.bf16.mxu0 %v1662_v0 }
 0x32b   :  { %1307 = vmatpush3.bf16.msra.mxu0 %v1745_v5 }
 0x32c   :  { %1308 = vmatprep.subr.bf16.mxu0 %v1662_v0 }
 0x32f   :  { %1309 = vmatpush3.bf16.msra.mxu0 %v1754_v6 }
 0x330   :  { %1310 = vmatprep.subr.bf16.mxu0 %v1662_v0 }
 0x333   :  { %1311 = vmatpush3.bf16.msra.mxu0 %v1763_v7 }
 0x334   :  { %1312 = vmatprep.subr.bf16.mxu0 %v1662_v0 }
 0x337   :  { %1313 = vmatpush3.bf16.msra.mxu0 %v1772_v8 }
 0x338   :  { %1338 = vmatprep.subr.bf16.mxu0 %v1662_v0 }
 0x3ed   :  { %v318_v38 = vpop.f32.mrb[4].mxu0 }
 0x3ee   :  { %v325_v39 = vadd.f32 %v1081_v36, %v318_v38  ;;  %v1276_v40 = vpop.f32.mrb[5].mxu0 }
 0x3ef   :  { %v321_v41 = vpop.f32.mrb[6].mxu0 }
 0x3f0   :  { %v1047_v42 = vmul.f32 -1.442695, %v325_v39  ;;  %v326_v43 = vadd.f32 %v1082_v37, %v321_v41  ;;  %v1277_v44 = vpop.f32.mrb[7].mxu0 }
 0x3f2   :  { %1558 = vpow2.f32 %v1047_v42  ;;  %v1048_v45 = vmul.f32 -1.442695, %v326_v43 }
 0x3f4   :  { %1560 = vpow2.f32 %v1048_v45 }
 0x3f5   :  { %1562 = vtanh.f32 %v325_v39 }
 0x3fc   :  { %v1559_v46 = vpop.eup %1558 }
 0x3fd   :  { %v335_v47 = vadd.f32 1.0, %v1559_v46 }
 0x3fe   :  { %v1561_v48 = vpop.eup %1560 }
 0x3ff   :  { %1564 = vrcp.f32 %v335_v47  ;;  %v336_v49 = vadd.f32 1.0, %v1561_v48  ;;  %v1563_v50 = vpop.eup %1562 }
 0x400   :  { %1566 = vtanh.f32 %v326_v43 }
 0x401   :  { %1568 = vrcp.f32 %v336_v49 }
 0x409   :  { %v1565_v51 = vpop.eup %1564 }
 0x40a   :  { %v1567_v52 = vpop.eup %1566  ;;  %v341_v53 = vsel %vm1802_vm3, %v1563_v50, %v1565_v51 }
 0x40b   :  { %v1569_v54 = vpop.eup %1568  ;;  %343 = vrot.lane.b32.xlu0 %v341_v53, %s1666_s15 }
 0x40c   :  { %v342_v55 = vsel %vm1802_vm3, %v1567_v52, %v1569_v54 }
 0x40d   :  { %345 = vrot.lane.b32.xlu1 %v342_v55, %s1666_s15 }
 0x40f   :  { %347 = vrot.lane.b32.xlu0 %v341_v53, %s1665_s14 }
 0x411   :  { %349 = vrot.lane.b32.xlu1 %v342_v55, %s1665_s14 }
 0x413   :  { %351 = vrot.lane.b32.xlu0 %v341_v53, %s1667_s16 }
 0x415   :  { %353 = vrot.lane.b32.xlu1 %v342_v55, %s1667_s16 }
 0x47d   :  { %v344_v56 = vpop.permute.xlu0 %343 }
 0x47e   :  { %v355_v59 = vmul.f32 %v344_v56, %v1855_v24 }
 0x47f   :  { %v346_v57 = vpop.permute.xlu1 %345 }
 0x480   :  { %v356_v62 = vmul.f32 %v346_v57, %v1858_v26  ;;  %v1106_v57 = vld [vmem:[%s2152_s0 + $0x20] sm:$0xff]  }
 0x481   :  { %v348_v58 = vpop.permute.xlu0 %347 }
 0x482   :  { %v357_v60 = vmul.f32 %v348_v58, %v341_v53  ;;  %v1089_v58 = vunpack.c.l.bf16 %v1106_v57 }
 0x483   :  { %v350_v61 = vpop.permute.xlu1 %349 }
 0x484   :  { %v1894_v63 = vadd.f32 %v357_v60, %v355_v59  ;;  %v358_v9 = vmul.f32 %v350_v61, %v342_v55  ;;  %v1090_v59 = vunpack.c.h.bf16 %v1106_v57 }
 0x485   :  { %v352_v13 = vpop.permute.xlu0 %351 }
 0x486   :  { %1570 = vtanh.f32 %v1894_v63  ;;  %v1897_v10 = vadd.f32 %v358_v9, %v356_v62 }
 0x487   :  { %v354_v14 = vpop.permute.xlu1 %353 }
 0x488   :  { %1572 = vtanh.f32 %v1897_v10 }
 0x490   :  { %v1571_v11 = vpop.eup %1570 }
 0x491   :  { %v363_v15 = vmul.f32 %v1571_v11, %v352_v13 }
 0x492   :  { %v1573_v12 = vpop.eup %1572 }
 0x493   :  { %v364_v16 = vmul.f32 %v1573_v12, %v354_v14 }
 0x495   :  { %v370_v17 = vpack.c.bf16 %v364_v16, %v363_v15 }
 0x497   :  { %1295 = vmatmul.mubr.bf16.vlgmr.msra.gmra.mrb[4].mxu1 %v370_v17 }
 0x498   :  { %1319 = vmatpush3.bf16.msra.mxu1 %v1707_v1  ;;  %1334 = vmatprep.mubr.msk.bf16.mxu1 %vm1663_vm0, %v1662_v0 }
 0x499   :  { %1320 = vmatprep.subr.bf16.mxu1 %v1662_v0 }
 0x49c   :  { %1321 = vmatpush3.bf16.msra.mxu1 %v1718_v2 }
 0x49d   :  { %1322 = vmatprep.subr.bf16.mxu1 %v1662_v0 }
 0x4a0   :  { %1323 = vmatpush3.bf16.msra.mxu1 %v1727_v3 }
 0x4a1   :  { %1324 = vmatprep.subr.bf16.mxu1 %v1662_v0 }
 0x4a4   :  { %1325 = vmatpush3.bf16.msra.mxu1 %v1736_v4 }
 0x4a5   :  { %1326 = vmatprep.subr.bf16.mxu1 %v1662_v0 }
 0x4a8   :  { %1327 = vmatpush3.bf16.msra.mxu1 %v1745_v5 }
 0x4a9   :  { %1328 = vmatprep.subr.bf16.mxu1 %v1662_v0 }
 0x4ac   :  { %1329 = vmatpush3.bf16.msra.mxu1 %v1754_v6 }
 0x4ad   :  { %1330 = vmatprep.subr.bf16.mxu1 %v1662_v0 }
 0x4b0   :  { %1331 = vmatpush3.bf16.msra.mxu1 %v1763_v7 }
 0x4b1   :  { %1332 = vmatprep.subr.bf16.mxu1 %v1662_v0 }
 0x4b4   :  { %1333 = vmatpush3.bf16.msra.mxu1 %v1772_v8 }
 0x4b5   :  { %1358 = vmatprep.subr.bf16.mxu1 %v1662_v0 }
 0x56a   :  { %v405_v21 = vpop.f32.mrb[4].mxu1 }
 0x56b   :  { %v412_v22 = vadd.f32 %v1085_v19, %v405_v21  ;;  %v1296_v23 = vpop.f32.mrb[5].mxu1 }
 0x56c   :  { %v408_v24 = vpop.f32.mrb[6].mxu1 }
 0x56d   :  { %v1051_v25 = vmul.f32 -1.442695, %v412_v22  ;;  %v413_v26 = vadd.f32 %v1086_v20, %v408_v24  ;;  %v1297_v28 = vpop.f32.mrb[7].mxu1 }
 0x56f   :  { %1574 = vpow2.f32 %v1051_v25  ;;  %v1052_v29 = vmul.f32 -1.442695, %v413_v26 }
 0x571   :  { %1576 = vpow2.f32 %v1052_v29 }
 0x572   :  { %1578 = vtanh.f32 %v412_v22 }
 0x579   :  { %v1575_v30 = vpop.eup %1574 }
 0x57a   :  { %v422_v31 = vadd.f32 1.0, %v1575_v30 }
 0x57b   :  { %v1577_v32 = vpop.eup %1576 }
 0x57c   :  { %1580 = vrcp.f32 %v422_v31  ;;  %v423_v33 = vadd.f32 1.0, %v1577_v32  ;;  %v1579_v34 = vpop.eup %1578 }
 0x57d   :  { %1582 = vtanh.f32 %v413_v26 }
 0x57e   :  { %1584 = vrcp.f32 %v423_v33 }
 0x586   :  { %v1581_v35 = vpop.eup %1580 }
 0x587   :  { %v1583_v36 = vpop.eup %1582  ;;  %v428_v37 = vsel %vm1802_vm3, %v1579_v34, %v1581_v35 }
 0x588   :  { %v1585_v38 = vpop.eup %1584  ;;  %430 = vrot.lane.b32.xlu0 %v428_v37, %s1666_s15 }
 0x589   :  { %v429_v39 = vsel %vm1802_vm3, %v1583_v36, %v1585_v38 }
 0x58a   :  { %432 = vrot.lane.b32.xlu1 %v429_v39, %s1666_s15 }
 0x58c   :  { %434 = vrot.lane.b32.xlu0 %v428_v37, %s1665_s14 }
 0x58e   :  { %436 = vrot.lane.b32.xlu1 %v429_v39, %s1665_s14 }
 0x590   :  { %438 = vrot.lane.b32.xlu0 %v428_v37, %s1667_s16 }
 0x592   :  { %440 = vrot.lane.b32.xlu1 %v429_v39, %s1667_s16 }
 0x5fa   :  { %v431_v40 = vpop.permute.xlu0 %430 }
 0x5fb   :  { %v442_v43 = vmul.f32 %v431_v40, %v1894_v63 }
 0x5fc   :  { %v433_v41 = vpop.permute.xlu1 %432 }
 0x5fd   :  { %v443_v46 = vmul.f32 %v433_v41, %v1897_v10 }
 0x5fe   :  { %v435_v42 = vpop.permute.xlu0 %434 }
 0x5ff   :  { %v444_v44 = vmul.f32 %v435_v42, %v428_v37 }
 0x600   :  { %v437_v45 = vpop.permute.xlu1 %436 }
 0x601   :  { %v1933_v47 = vadd.f32 %v444_v44, %v442_v43  ;;  %v445_v48 = vmul.f32 %v437_v45, %v429_v39 }
 0x602   :  { %v439_v52 = vpop.permute.xlu0 %438 }
 0x603   :  { %1586 = vtanh.f32 %v1933_v47  ;;  %v1936_v49 = vadd.f32 %v445_v48, %v443_v46 }
 0x604   :  { %v441_v53 = vpop.permute.xlu1 %440 }
 0x605   :  { %1588 = vtanh.f32 %v1936_v49 }
 0x60d   :  { %v1587_v50 = vpop.eup %1586 }
 0x60e   :  { %v450_v54 = vmul.f32 %v1587_v50, %v439_v52 }
 0x60f   :  { %v1589_v51 = vpop.eup %1588 }
 0x610   :  { %v451_v55 = vmul.f32 %v1589_v51, %v441_v53 }
 0x612   :  { %v457_v56 = vpack.c.bf16 %v451_v55, %v450_v54 }
 0x614   :  { %1315 = vmatmul.mubr.bf16.vlgmr.msra.gmra.mrb[8].mxu0 %v457_v56 }
 0x615   :  { %1339 = vmatpush3.bf16.msra.mxu0 %v1707_v1  ;;  %1354 = vmatprep.mubr.msk.bf16.mxu0 %vm1663_vm0, %v1662_v0 }
 0x616   :  { %1340 = vmatprep.subr.bf16.mxu0 %v1662_v0 }
 0x619   :  { %1341 = vmatpush3.bf16.msra.mxu0 %v1718_v2 }
 0x61a   :  { %1342 = vmatprep.subr.bf16.mxu0 %v1662_v0 }
 0x61d   :  { %1343 = vmatpush3.bf16.msra.mxu0 %v1727_v3 }
 0x61e   :  { %1344 = vmatprep.subr.bf16.mxu0 %v1662_v0 }
 0x621   :  { %1345 = vmatpush3.bf16.msra.mxu0 %v1736_v4 }
 0x622   :  { %1346 = vmatprep.subr.bf16.mxu0 %v1662_v0 }
 0x625   :  { %1347 = vmatpush3.bf16.msra.mxu0 %v1745_v5 }
 0x626   :  { %1348 = vmatprep.subr.bf16.mxu0 %v1662_v0 }
 0x629   :  { %1349 = vmatpush3.bf16.msra.mxu0 %v1754_v6 }
 0x62a   :  { %1350 = vmatprep.subr.bf16.mxu0 %v1662_v0 }
 0x62d   :  { %1351 = vmatpush3.bf16.msra.mxu0 %v1763_v7 }
 0x62e   :  { %1352 = vmatprep.subr.bf16.mxu0 %v1662_v0 }
 0x631   :  { %1353 = vmatpush3.bf16.msra.mxu0 %v1772_v8 }
 0x6e7   :  { %v492_v60 = vpop.f32.mrb[8].mxu0 }
 0x6e8   :  { %v499_v61 = vadd.f32 %v1089_v58, %v492_v60  ;;  %v1316_v62 = vpop.f32.mrb[9].mxu0 }
 0x6e9   :  { %v495_v63 = vpop.f32.mrb[10].mxu0 }
 0x6ea   :  { %v1055_v9 = vmul.f32 -1.442695, %v499_v61  ;;  %v500_v10 = vadd.f32 %v1090_v59, %v495_v63  ;;  %v1317_v11 = vpop.f32.mrb[11].mxu0 }
 0x6ec   :  { %1590 = vpow2.f32 %v1055_v9  ;;  %v1056_v12 = vmul.f32 -1.442695, %v500_v10 }
 0x6ee   :  { %1592 = vpow2.f32 %v1056_v12 }
 0x6ef   :  { %1594 = vtanh.f32 %v499_v61 }
 0x6f6   :  { %v1591_v13 = vpop.eup %1590 }
 0x6f7   :  { %v509_v14 = vadd.f32 1.0, %v1591_v13 }
 0x6f8   :  { %v1593_v15 = vpop.eup %1592 }
 0x6f9   :  { %1596 = vrcp.f32 %v509_v14  ;;  %v510_v16 = vadd.f32 1.0, %v1593_v15  ;;  %v1595_v17 = vpop.eup %1594  ;;  %v1108_v15 = vld [vmem:[%s2152_s0 + $0x30] sm:$0xff]  }
 0x6fa   :  { %1598 = vtanh.f32 %v500_v10 }
 0x6fb   :  { %1600 = vrcp.f32 %v510_v16  ;;  %v1097_v16 = vunpack.c.l.bf16 %v1108_v15 }
 0x703   :  { %v1597_v18 = vpop.eup %1596 }
 0x704   :  { %v1599_v19 = vpop.eup %1598  ;;  %v515_v20 = vsel %vm1802_vm3, %v1595_v17, %v1597_v18  ;;  %v1098_v17 = vunpack.c.h.bf16 %v1108_v15 }
 0x705   :  { %v1601_v21 = vpop.eup %1600  ;;  %517 = vrot.lane.b32.xlu0 %v515_v20, %s1666_s15 }
 0x706   :  { %v516_v22 = vsel %vm1802_vm3, %v1599_v19, %v1601_v21 }
 0x707   :  { %519 = vrot.lane.b32.xlu1 %v516_v22, %s1666_s15 }
 0x709   :  { %521 = vrot.lane.b32.xlu0 %v515_v20, %s1665_s14 }
 0x70b   :  { %523 = vrot.lane.b32.xlu1 %v516_v22, %s1665_s14 }
 0x70d   :  { %525 = vrot.lane.b32.xlu0 %v515_v20, %s1667_s16 }
 0x70f   :  { %527 = vrot.lane.b32.xlu1 %v516_v22, %s1667_s16 }
 0x777   :  { %v518_v23 = vpop.permute.xlu0 %517 }
 0x778   :  { %v529_v26 = vmul.f32 %v518_v23, %v1933_v47 }
 0x779   :  { %v520_v24 = vpop.permute.xlu1 %519 }
 0x77a   :  { %v530_v30 = vmul.f32 %v520_v24, %v1936_v49 }
 0x77b   :  { %v522_v25 = vpop.permute.xlu0 %521 }
 0x77c   :  { %v531_v28 = vmul.f32 %v522_v25, %v515_v20 }
 0x77d   :  { %v524_v29 = vpop.permute.xlu1 %523 }
 0x77e   :  { %v1971_v31 = vadd.f32 %v531_v28, %v529_v26  ;;  %v532_v32 = vmul.f32 %v524_v29, %v516_v22 }
 0x77f   :  { %v526_v36 = vpop.permute.xlu0 %525 }
 0x780   :  { %1602 = vtanh.f32 %v1971_v31  ;;  %v1974_v33 = vadd.f32 %v532_v32, %v530_v30 }
 0x781   :  { %v528_v37 = vpop.permute.xlu1 %527 }
 0x782   :  { %1604 = vtanh.f32 %v1974_v33 }
 0x78a   :  { %v1603_v34 = vpop.eup %1602 }
 0x78b   :  { %v537_v38 = vmul.f32 %v1603_v34, %v526_v36 }
 0x78c   :  { %v1605_v35 = vpop.eup %1604 }
 0x78d   :  { %v538_v39 = vmul.f32 %v1605_v35, %v528_v37 }
 0x78f   :  { %v544_v40 = vpack.c.bf16 %v538_v39, %v537_v38 }
 0x791   :  { %1335 = vmatmul.mubr.bf16.vlgmr.msra.gmra.mrb[8].mxu1 %v544_v40 }
 0x792   :  { %1359 = vmatpush3.bf16.msra.mxu1 %v1707_v1  ;;  %1374 = vmatprep.mubr.msk.bf16.mxu1 %vm1663_vm0, %v1662_v0  ;;  %v1107_v1 = vld [vmem:[%s2152_s0 + $0x28] sm:$0xff]  }
 0x793   :  { %1360 = vmatprep.subr.bf16.mxu1 %v1662_v0 }
 0x796   :  { %1361 = vmatpush3.bf16.msra.mxu1 %v1718_v2  ;;  %v1093_v2 = vunpack.c.l.bf16 %v1107_v1 }
 0x797   :  { %1362 = vmatprep.subr.bf16.mxu1 %v1662_v0 }
 0x79a   :  { %1363 = vmatpush3.bf16.msra.mxu1 %v1727_v3  ;;  %v1094_v3 = vunpack.c.h.bf16 %v1107_v1 }
 0x79b   :  { %1364 = vmatprep.subr.bf16.mxu1 %v1662_v0 }
 0x79e   :  { %1365 = vmatpush3.bf16.msra.mxu1 %v1736_v4 }
 0x79f   :  { %1366 = vmatprep.subr.bf16.mxu1 %v1662_v0 }
 0x7a2   :  { %1367 = vmatpush3.bf16.msra.mxu1 %v1745_v5 }
 0x7a3   :  { %1368 = vmatprep.subr.bf16.mxu1 %v1662_v0 }
 0x7a6   :  { %1369 = vmatpush3.bf16.msra.mxu1 %v1754_v6 }
 0x7a7   :  { %1370 = vmatprep.subr.bf16.mxu1 %v1662_v0 }
 0x7aa   :  { %1371 = vmatpush3.bf16.msra.mxu1 %v1763_v7 }
 0x7ab   :  { %1372 = vmatprep.subr.bf16.mxu1 %v1662_v0 }
 0x7ae   :  { %1373 = vmatpush3.bf16.msra.mxu1 %v1772_v8 }
 0x864   :  { %v579_v4 = vpop.f32.mrb[8].mxu1 }
 0x865   :  { %v586_v5 = vadd.f32 %v1093_v2, %v579_v4  ;;  %v1336_v41 = vpop.f32.mrb[9].mxu1 }
 0x866   :  { %v582_v42 = vpop.f32.mrb[10].mxu1 }
 0x867   :  { %v1059_v43 = vmul.f32 -1.442695, %v586_v5  ;;  %v587_v6 = vadd.f32 %v1094_v3, %v582_v42  ;;  %v1337_v44 = vpop.f32.mrb[11].mxu1 }
 0x869   :  { %1606 = vpow2.f32 %v1059_v43  ;;  %v1060_v45 = vmul.f32 -1.442695, %v587_v6 }
 0x86b   :  { %1608 = vpow2.f32 %v1060_v45 }
 0x86c   :  { %1610 = vtanh.f32 %v586_v5 }
 0x873   :  { %v1607_v7 = vpop.eup %1606 }
 0x874   :  { %v596_v0 = vadd.f32 1.0, %v1607_v7 }
 0x875   :  { %v1609_v46 = vpop.eup %1608 }
 0x876   :  { %1612 = vrcp.f32 %v596_v0  ;;  %v597_v8 = vadd.f32 1.0, %v1609_v46  ;;  %v1611_v47 = vpop.eup %1610  ;;  %v807_v46 = vld [vmem:[%s2153_s2] sm:$0xff] }
 0x877   :  { %1614 = vtanh.f32 %v587_v6 }
 0x878   :  { %1616 = vrcp.f32 %v597_v8  ;;  %v808_v8 = vld [vmem:[%s2153_s2 + $0x8] sm:$0xff] }
 0x880   :  { %v1613_v48 = vpop.eup %1612 }
 0x881   :  { %v1615_v49 = vpop.eup %1614  ;;  %v602_v50 = vsel %vm1802_vm3, %v1611_v47, %v1613_v48  ;;  %v809_v47 = vld [vmem:[%s2153_s2 + $0x10] sm:$0xff]  ;;  %v1448_v48 = vpack.c.bf16 %v808_v8, %v807_v46  ;;  %v919_v8 = vld [vmem:[%s2154_s4 + $0x60] sm:$0xff] }
 0x882   :  { %v1617_v51 = vpop.eup %1616  ;;  %604 = vrot.lane.b32.xlu0 %v602_v50, %s1666_s15 }
 0x883   :  { %v603_v52 = vsel %vm1802_vm3, %v1615_v49, %v1617_v51  ;;  %v810_v49 = vld [vmem:[%s2153_s2 + $0x18] sm:$0xff]  ;;  %v811_v51 = vld [vmem:[%s2153_s2 + $0x20] sm:$0xff]  ;;  %1449 = vmatprep.subr.bf16.mxu0 %v1448_v48 }
 0x884   :  { %606 = vrot.lane.b32.xlu1 %v603_v52, %s1666_s15 }
 0x886   :  { %608 = vrot.lane.b32.xlu0 %v602_v50, %s1665_s14 }
 0x888   :  { %610 = vrot.lane.b32.xlu1 %v603_v52, %s1665_s14 }
 0x88a   :  { %612 = vrot.lane.b32.xlu0 %v602_v50, %s1667_s16 }
 0x88c   :  { %614 = vrot.lane.b32.xlu1 %v603_v52, %s1667_s16 }
 0x8f4   :  { %v605_v53 = vpop.permute.xlu0 %604 }
 0x8f5   :  { %v616_v56 = vmul.f32 %v605_v53, %v1971_v31 }
 0x8f6   :  { %v607_v54 = vpop.permute.xlu1 %606 }
 0x8f7   :  { %v617_v59 = vmul.f32 %v607_v54, %v1974_v33  ;;  %v1109_v54 = vld [vmem:[%s2152_s0 + $0x38] sm:$0xff]  }
 0x8f8   :  { %v609_v55 = vpop.permute.xlu0 %608 }
 0x8f9   :  { %v618_v57 = vmul.f32 %v609_v55, %v602_v50  ;;  %v1452_v50 = vpack.c.bf16 %v810_v49, %v809_v47  ;;  %v1101_v55 = vunpack.c.l.bf16 %v1109_v54  ;;  %v920_v47 = vld [vmem:[%s2154_s4 + $0x68] sm:$0xff] }
 0x8fa   :  { %v611_v58 = vpop.permute.xlu1 %610 }
 0x8fb   :  { %v620_v60 = vadd.f32 %v618_v57, %v616_v56  ;;  %v619_v61 = vmul.f32 %v611_v58, %v603_v52  ;;  %v812_v52 = vld [vmem:[%s2153_s2 + $0x28] sm:$0xff]  ;;  %v1102_v56 = vunpack.c.h.bf16 %v1109_v54 }
 0x8fc   :  { %v613_v10 = vpop.permute.xlu0 %612  ;;  %v1456_v53 = vpack.c.bf16 %v812_v52, %v811_v51 }
 0x8fd   :  { %1618 = vtanh.f32 %v620_v60  ;;  %v621_v62 = vadd.f32 %v619_v61, %v617_v59 }
 0x8fe   :  { %v615_v11 = vpop.permute.xlu1 %614 }
 0x8ff   :  { %1620 = vtanh.f32 %v621_v62 }
 0x907   :  { %v1619_v63 = vpop.eup %1618 }
 0x908   :  { %v624_v12 = vmul.f32 %v1619_v63, %v613_v10 }
 0x909   :  { %v1621_v9 = vpop.eup %1620 }
 0x90a   :  { %v625_v13 = vmul.f32 %v1621_v9, %v615_v11 }
 0x90c   :  { %v631_v14 = vpack.c.bf16 %v625_v13, %v624_v12  ;;  %v813_v12 = vld [vmem:[%s2153_s2 + $0x30] sm:$0xff]  ;;  %v814_v13 = vld [vmem:[%s2153_s2 + $0x38] sm:$0xff] }
 0x90d   :  { %v1460_v15 = vpack.c.bf16 %v814_v13, %v813_v12 }
 0x90e   :  { %1355 = vmatmul.mubr.bf16.vlgmr.msra.gmra.mrb[12].mxu0 %v631_v14 }
 0x90f   :  { %1451 = vmatpush3.bf16.msra.mxu0 %v1448_v48  ;;  %v1504_v48 = vpack.c.bf16 %v920_v47, %v919_v8 }
 0x910   :  { %1453 = vmatprep.subr.bf16.mxu0 %v1452_v50 }
 0x913   :  { %1455 = vmatpush3.bf16.msra.mxu0 %v1452_v50 }
 0x914   :  { %1457 = vmatprep.subr.bf16.mxu0 %v1456_v53 }
 0x917   :  { %1459 = vmatpush3.bf16.msra.mxu0 %v1456_v53 }
 0x918   :  { %1461 = vmatprep.subr.bf16.mxu0 %v1460_v15 }
 0x91b   :  { %1463 = vmatpush3.bf16.msra.mxu0 %v1460_v15 }
 0x9e1   :  { %v666_v18 = vpop.f32.mrb[12].mxu0 }
 0x9e2   :  { %v673_v19 = vadd.f32 %v1097_v16, %v666_v18  ;;  %v1356_v20 = vpop.f32.mrb[13].mxu0  ;;  %v816_v18 = vld [vmem:[%s2153_s2 + $0x48] sm:$0xff] }
 0x9e3   :  { %v669_v21 = vpop.f32.mrb[14].mxu0  ;;  %v817_v20 = vld [vmem:[%s2153_s2 + $0x50] sm:$0xff] }
 0x9e4   :  { %v1063_v22 = vmul.f32 -1.442695, %v673_v19  ;;  %v674_v23 = vadd.f32 %v1098_v17, %v669_v21  ;;  %v1357_v24 = vpop.f32.mrb[15].mxu0  ;;  %v815_v17 = vld [vmem:[%s2153_s2 + $0x40] sm:$0xff]  ;;  %v818_v21 = vld [vmem:[%s2153_s2 + $0x58] sm:$0xff] }
 0x9e6   :  { %1622 = vpow2.f32 %v1063_v22  ;;  %v1064_v25 = vmul.f32 -1.442695, %v674_v23  ;;  %v1468_v22 = vpack.c.bf16 %v818_v21, %v817_v20 }
 0x9e8   :  { %1624 = vpow2.f32 %v1064_v25  ;;  %v819_v25 = vld [vmem:[%s2153_s2 + $0x60] sm:$0xff] }
 0x9e9   :  { %1626 = vtanh.f32 %v673_v19  ;;  %v1464_v19 = vpack.c.bf16 %v816_v18, %v815_v17  ;;  %v1070_v18 = vld [vmem:[%s2156_s5] ss:$0 sm:$0xff] }
 0x9eb   :  { %1465 = vmatprep.subr.bf16.mxu0 %v1464_v19 }
 0x9ec   :  { %1467 = vmatpush3.bf16.msra.mxu0 %v1464_v19 }
 0x9ed   :  { %1469 = vmatprep.subr.bf16.mxu0 %v1468_v22 }
 0x9f0   :  { %v1623_v26 = vpop.eup %1622  ;;  %1471 = vmatpush3.bf16.msra.mxu0 %v1468_v22 }
 0x9f1   :  { %v683_v28 = vadd.f32 1.0, %v1623_v26  ;;  %v820_v26 = vld [vmem:[%s2153_s2 + $0x68] sm:$0xff] }
 0x9f2   :  { %v1625_v29 = vpop.eup %1624 }
 0x9f3   :  { %1628 = vrcp.f32 %v683_v28  ;;  %v684_v30 = vadd.f32 1.0, %v1625_v29  ;;  %v1627_v31 = vpop.eup %1626  ;;  %v1472_v29 = vpack.c.bf16 %v820_v26, %v819_v25 }
 0x9f4   :  { %1630 = vtanh.f32 %v674_v23 }
 0x9f5   :  { %1632 = vrcp.f32 %v684_v30  ;;  %1473 = vmatprep.subr.bf16.mxu0 %v1472_v29 }
 0x9f6   :  { %1475 = vmatpush3.bf16.msra.mxu0 %v1472_v29 }
 0x9fd   :  { %v1629_v32 = vpop.eup %1628 }
 0x9fe   :  { %v1631_v33 = vpop.eup %1630  ;;  %v689_v34 = vsel %vm1802_vm3, %v1627_v31, %v1629_v32  ;;  %v821_v32 = vld [vmem:[%s2153_s2 + $0x70] sm:$0xff] }
 0x9ff   :  { %v1633_v35 = vpop.eup %1632  ;;  %691 = vrot.lane.b32.xlu0 %v689_v34, %s1666_s15 }
 0xa00   :  { %v690_v36 = vsel %vm1802_vm3, %v1631_v33, %v1633_v35  ;;  %v822_v33 = vld [vmem:[%s2153_s2 + $0x78] sm:$0xff] }
 0xa01   :  { %693 = vrot.lane.b32.xlu1 %v690_v36, %s1666_s15  ;;  %v1476_v35 = vpack.c.bf16 %v822_v33, %v821_v32 }
 0xa03   :  { %695 = vrot.lane.b32.xlu0 %v689_v34, %s1665_s14  ;;  %1477 = vmatprep.subr.bf16.mxu0 %v1476_v35 }
 0xa04   :  { %1479 = vmatpush3.bf16.msra.mxu0 %v1476_v35 }
 0xa05   :  { %697 = vrot.lane.b32.xlu1 %v690_v36, %s1665_s14 }
 0xa07   :  { %699 = vrot.lane.b32.xlu0 %v689_v34, %s1667_s16 }
 0xa09   :  { %701 = vrot.lane.b32.xlu1 %v690_v36, %s1667_s16 }
 0xa71   :  { %v692_v37 = vpop.permute.xlu0 %691 }
 0xa72   :  { %v703_v40 = vmul.f32 %v692_v37, %v620_v60  ;;  %v909_v37 = vld [vmem:[%s2154_s4 + $0x10] sm:$0xff] }
 0xa73   :  { %v694_v38 = vpop.permute.xlu1 %693 }
 0xa74   :  { %v704_v3 = vmul.f32 %v694_v38, %v621_v62 }
 0xa75   :  { %v696_v39 = vpop.permute.xlu0 %695 }
 0xa76   :  { %v705_v1 = vmul.f32 %v696_v39, %v689_v34  ;;  %v910_v39 = vld [vmem:[%s2154_s4 + $0x18] sm:$0xff] }
 0xa77   :  { %v698_v2 = vpop.permute.xlu1 %697 }
 0xa78   :  { %v2022_v4 = vadd.f32 %v705_v1, %v703_v40  ;;  %v706_v5 = vmul.f32 %v698_v2, %v690_v36  ;;  %v907_v36 = vld [vmem:[%s2154_s4] sm:$0xff]  ;;  %v1484_v40 = vpack.c.bf16 %v910_v39, %v909_v37  ;;  %v912_v2 = vld [vmem:[%s2154_s4 + $0x28] sm:$0xff] }
 0xa79   :  { %v700_v6 = vpop.permute.xlu0 %699  ;;  %v1480_v38 = vpack.c.bf16 %v908_v27, %v907_v36  ;;  %v911_v1 = vld [vmem:[%s2154_s4 + $0x20] sm:$0xff] }
 0xa7a   :  { %1634 = vtanh.f32 %v2022_v4  ;;  %v2025_v41 = vadd.f32 %v706_v5, %v704_v3  ;;  %v1488_v3 = vpack.c.bf16 %v912_v2, %v911_v1  ;;  %v913_v5 = vld [vmem:[%s2154_s4 + $0x30] sm:$0xff] }
 0xa7b   :  { %v702_v44 = vpop.permute.xlu1 %701  ;;  %1481 = vmatprep.subr.bf16.mxu1 %v1480_v38 }
 0xa7c   :  { %1636 = vtanh.f32 %v2025_v41 }
 0xa84   :  { %v1635_v42 = vpop.eup %1634 }
 0xa85   :  { %v711_v45 = vmul.f32 %v1635_v42, %v700_v6  ;;  %v914_v42 = vld [vmem:[%s2154_s4 + $0x38] sm:$0xff]  ;;  %v915_v6 = vld [vmem:[%s2154_s4 + $0x40] sm:$0xff] }
 0xa86   :  { %v1637_v43 = vpop.eup %1636 }
 0xa87   :  { %v712_v7 = vmul.f32 %v1637_v43, %v702_v44  ;;  %v1492_v43 = vpack.c.bf16 %v914_v42, %v913_v5  ;;  %v916_v44 = vld [vmem:[%s2154_s4 + $0x48] sm:$0xff] }
 0xa89   :  { %v718_v0 = vpack.c.bf16 %v712_v7, %v711_v45  ;;  %v1496_v45 = vpack.c.bf16 %v916_v44, %v915_v6  ;;  %v917_v7 = vld [vmem:[%s2154_s4 + $0x50] sm:$0xff] }
 0xa8b   :  { %1375 = vmatmul.mubr.bf16.vlgmr.msra.gmra.mrb[12].mxu1 %v718_v0  ;;  %v918_v0 = vld [vmem:[%s2154_s4 + $0x58] sm:$0xff] }
 0xa8c   :  { %1483 = vmatpush3.bf16.msra.mxu1 %v1480_v38  ;;  %v1500_v46 = vpack.c.bf16 %v918_v0, %v917_v7 }
 0xa8d   :  { %1485 = vmatprep.subr.bf16.mxu1 %v1484_v40 }
 0xa90   :  { %1487 = vmatpush3.bf16.msra.mxu1 %v1484_v40 }
 0xa91   :  { %1489 = vmatprep.subr.bf16.mxu1 %v1488_v3 }
 0xa94   :  { %1491 = vmatpush3.bf16.msra.mxu1 %v1488_v3 }
 0xa95   :  { %1493 = vmatprep.subr.bf16.mxu1 %v1492_v43 }
 0xa98   :  { %1495 = vmatpush3.bf16.msra.mxu1 %v1492_v43 }
 0xa99   :  { %1497 = vmatprep.subr.bf16.mxu1 %v1496_v45 }
 0xa9c   :  { %1499 = vmatpush3.bf16.msra.mxu1 %v1496_v45 }
 0xa9d   :  { %1501 = vmatprep.subr.bf16.mxu1 %v1500_v46 }
 0xaa0   :  { %1503 = vmatpush3.bf16.msra.mxu1 %v1500_v46 }
 0xaa1   :  { %1505 = vmatprep.subr.bf16.mxu1 %v1504_v48 }
 0xaa4   :  { %1507 = vmatpush3.bf16.msra.mxu1 %v1504_v48 }
 0xb5e   :  { %v753_v57 = vpop.f32.mrb[12].mxu1 }
 0xb5f   :  { %v760_v58 = vadd.f32 %v1101_v55, %v753_v57  ;;  %v1376_v59 = vpop.f32.mrb[13].mxu1 }
 0xb60   :  { %v756_v60 = vpop.f32.mrb[14].mxu1 }
 0xb61   :  { %v1067_v61 = vmul.f32 -1.442695, %v760_v58  ;;  %v761_v62 = vadd.f32 %v1102_v56, %v756_v60  ;;  %v1377_v63 = vpop.f32.mrb[15].mxu1 }
 0xb63   :  { %1638 = vpow2.f32 %v1067_v61  ;;  %v1068_v9 = vmul.f32 -1.442695, %v761_v62 }
 0xb65   :  { %1640 = vpow2.f32 %v1068_v9 }
 0xb66   :  { %1642 = vtanh.f32 %v760_v58 }
 0xb6d   :  { %v1639_v10 = vpop.eup %1638 }
 0xb6e   :  { %v770_v11 = vadd.f32 1.0, %v1639_v10  ;;  %v922_v10 = vld [vmem:[%s2154_s4 + $0x78] sm:$0xff] }
 0xb6f   :  { %v1641_v14 = vpop.eup %1640 }
 0xb70   :  { %1644 = vrcp.f32 %v770_v11  ;;  %v771_v16 = vadd.f32 1.0, %v1641_v14  ;;  %v1643_v23 = vpop.eup %1642 }
 0xb72   :  { %1646 = vrcp.f32 %v771_v16 }
 0xb73   :  { %1648 = vtanh.f32 %v761_v62 }
 0xb7a   :  { %v1645_v24 = vpop.eup %1644 }
 0xb7b   :  { %v776_v28 = vsel %vm1802_vm3, %v1643_v23, %v1645_v24 }
 0xb7c   :  { %v1647_v30 = vpop.eup %1646  ;;  %782 = vrot.lane.b32.xlu1 %v776_v28, %s1665_s14  ;;  %778 = vrot.lane.b32.xlu0 %v776_v28, %s1666_s15 }
 0xb7d   :  { %v1649_v31 = vpop.eup %1648 }
 0xb7e   :  { %v777_v34 = vsel %vm1802_vm3, %v1649_v31, %v1647_v30 }
 0xb80   :  { %784 = vrot.lane.b32.xlu1 %v777_v34, %s1665_s14  ;;  %780 = vrot.lane.b32.xlu0 %v777_v34, %s1666_s15 }
 0xb84   :  { %788 = vrot.lane.b32.xlu1 %v777_v34, %s1667_s16  ;;  %786 = vrot.lane.b32.xlu0 %v776_v28, %s1667_s16 }
 0xbee   :  { %v783_v49 = vpop.permute.xlu1 %782  ;;  %v779_v50 = vpop.permute.xlu0 %778 }
 0xbef   :  { %v792_v51 = vmul.f32 %v783_v49, %v776_v28  ;;  %v790_v52 = vmul.f32 %v779_v50, %v2022_v4  ;;  %v921_v4 = vld [vmem:[%s2154_s4 + $0x70] sm:$0xff] }
 0xbf0   :  { %v1508_v11 = vpack.c.bf16 %v922_v10, %v921_v4 }
 0xbf1   :  { %v794_v53 = vadd.f32 %v792_v51, %v790_v52 }
 0xbf2   :  { %v785_v54 = vpop.permute.xlu1 %784  ;;  %v781_v55 = vpop.permute.xlu0 %780  ;;  %1509 = vmatprep.subr.bf16.mxu1 %v1508_v11 }
 0xbf3   :  { %1650 = vtanh.f32 %v794_v53  ;;  %v793_v56 = vmul.f32 %v785_v54, %v777_v34  ;;  %v791_v57 = vmul.f32 %v781_v55, %v2025_v41  ;;  %1511 = vmatpush3.bf16.msra.mxu1 %v1508_v11  ;;  %v1069_v41 = vld [vmem:[%s2155_s3] ss:$0 sm:$0xff] }
 0xbf5   :  { %v795_v58 = vadd.f32 %v793_v56, %v791_v57 }
 0xbf6   :  { %v787_v60 = vpop.permute.xlu0 %786  ;;  %v789_v63 = vpop.permute.xlu1 %788 }
 0xbf7   :  { %1652 = vtanh.f32 %v795_v58 }
 0xbfd   :  { %v1651_v59 = vpop.eup %1650 }
 0xbfe   :  { %v798_v61 = vmul.f32 %v1651_v59, %v787_v60 }
 0xc00   :  { %1410 = vmatprep.mubr.f32.mxu0 %v798_v61 }
 0xc01   :  { %v1653_v62 = vpop.eup %1652 }
 0xc02   :  { %v799_v9 = vmul.f32 %v1653_v62, %v789_v63 }
 0xc04   :  { %1411 = vmatmul.mubr.f32.vlgmr.msra.gmra.mrb[16].mxu0 %v799_v9 }
 0xcd7   :  { %v1412_v12 = vpop.f32.mrb[16].mxu0 }
 0xcd8   :  { %v902_v13 = vadd.f32 %v1412_v12, %v1069_v41  ;;  %v896_v14 = vpop.f32.mrb[17].mxu0 }
 0xcd9   :  { %v897_v15 = vadd.f32 %v1069_v41, %v896_v14 }
 0xcda   :  { %v906_v17 = vmax.f32 %v902_v13, 0.0 }
 0xcdb   :  { %v905_v16 = vmax.f32 %v897_v15, 0.0 }
 0xcdd   :  { %1445 = vmatprep.mubr.f32.mxu1 %v905_v16 }
 0xcde   :  { %1446 = vmatmul.mubr.f32.vlgmr.msra.gmra.mrb[16].mxu1 %v906_v17 }
 0xdb1   :  { %v1447_v19 = vpop.f32.mrb[16].mxu1 }
 0xdb2   :  { %v1002_v20 = vadd.f32 %v1447_v19, %v1070_v18  ;;  %v996_v21 = vpop.f32.mrb[17].mxu1 }
 0xdb3   :  { %v997_v22 = vadd.f32 %v1070_v18, %v996_v21 }
 0xdb4   :  { %1007 = vmax.xlane.f32.xlu1 %v1002_v20 }
 0xdb5   :  { %1005 = vmax.xlane.f32.xlu0 %v997_v22 }
 0xe41   :  { %v1008_v23 = vpop.xlane.xlu1 %1007 }
 0xe42   :  { %v1006_v24 = vpop.xlane.xlu0 %1005  ;;  %v1010_v25 = vsub.f32 %v1002_v20, %v1008_v23 }
 0xe43   :  { %v1009_v26 = vsub.f32 %v997_v22, %v1006_v24 }
 0xe44   :  { %v1013_v29 = vmul.f32 1.442695, %v1010_v25 }
 0xe45   :  { %v1011_v28 = vmul.f32 1.442695, %v1009_v26 }
 0xe47   :  { %1654 = vpow2.f32 %v1011_v28 }
 0xe48   :  { %1656 = vpow2.f32 %v1013_v29 }
 0xe51   :  { %v1655_v30 = vpop.eup %1654 }
 0xe52   :  { %1015 = vadd.xlane.f32.xlu0 %v1655_v30  ;;  %v1657_v31 = vpop.eup %1656 }
 0xe56   :  { %1017 = vadd.xlane.f32.xlu0 %v1657_v31 }
 0xedf   :  { %v1016_v32 = vpop.xlane.xlu0 %1015 }
 0xee0   :  { %1658 = vlog2.f32 %v1016_v32 }
 0xee3   :  { %v1018_v33 = vpop.xlane.xlu0 %1017 }
 0xee4   :  { %1660 = vlog2.f32 %v1018_v33 }
 0xeea   :  { %v1659_v34 = vpop.eup %1658 }
 0xeeb   :  { %v1020_v35 = vmul.f32 0.6931472, %v1659_v34 }
 0xeed   :  { %v1023_v36 = vsub.f32 %v1009_v26, %v1020_v35 }
 0xeee   :  { %v1661_v27 = vpop.eup %1660 }
 0xeef   :  { %1025 = vst [vmem:[%s2157_s6] sm:$0xff] %v1023_v36  ;;  %v1022_v37 = vmul.f32 0.6931472, %v1661_v27 }
 0xef1   :  { %v1024_v38 = vsub.f32 %v1010_v25, %v1022_v37 }
 0xef3   :  { %1026 = vst [vmem:[%s2157_s6 + $0x8] sm:$0xff] %v1024_v38 }

</bundles_post_ra>
